<compile_context>
chip_gen: v6e
topology: v6e:2x2x1
jax: 0.10.0
libtpu: 0.0.40
codegen_flags: <defaults>
</compile_context>

<pallas_src>
import math

import jax
import jax.numpy as jnp
from jax.experimental import pallas as pl
from jax.experimental.pallas import tpu as pltpu

LOG_2PI = math.log(2.0 * math.pi)


def _round_up(v, m):
    return ((v + m - 1) // m) * m


def generative_classifier_forward(x, w_clf, b_clf, w_enc, b_enc, means, vars_,
                                  *, batch_tile=128):
    """x: [B, C_in, H, W] float32 (NCHW). Returns probs: [B] float32."""
    B = x.shape[0]
    F = int(math.prod(x.shape[1:]))
    C = int(w_clf.shape[1])          # n_classes
    D = int(w_enc.shape[1])          # n_dim

    # ---- layout / tiling ---------------------------------------------------
    # Samples on the lane axis: pass x transposed, [F, B] (layout plumbing so
    # the per-sample output is lane-dense; 64 KB at the demo shapes).
    x_t = x.reshape(B, F).T.astype(jnp.float32)               # [F, B]

    tb = B if B <= batch_tile else batch_tile                  # batch tile
    Bp = _round_up(B, tb)                                      # padded batch
    if Bp != B:
        x_t = jnp.pad(x_t, ((0, 0), (0, Bp - B)))

    ZO = _round_up(C, 8)                    # 8-aligned sublane offset of z rows
    Np = max(128, _round_up(ZO + D, 128))   # padded fused output-feature rows

    # ---- fused weight / bias (classifier rows then encoder rows) -----------
    w_cat_t = jnp.zeros((Np, F), jnp.float32)
    w_cat_t = w_cat_t.at[:C, :].set(w_clf.T.astype(jnp.float32))
    w_cat_t = w_cat_t.at[ZO:ZO + D, :].set(w_enc.T.astype(jnp.float32))
    # NOTE: at scaled-up F/D (esp. v7x's 64 MiB VMEM) this constant block
    # should be single-buffered or F-tiled; irrelevant at these shapes.

    b_cat_t = jnp.zeros((Np, 1), jnp.float32)
    b_cat_t = b_cat_t.at[:C, 0].set(b_clf.astype(jnp.float32))
    b_cat_t = b_cat_t.at[ZO:ZO + D, 0].set(b_enc.astype(jnp.float32))

    # ---- class-summed Gaussian constants (computed once, outside kernel) ---
    means_f = means.astype(jnp.float32)                        # [C, D]
    vars_f = vars_.astype(jnp.float32)                         # [C, D]
    inv_var = 1.0 / vars_f
    a_vec = jnp.sum(inv_var, axis=0)                           # [D]
    b_vec = jnp.sum(means_f * inv_var, axis=0)                 # [D]
    c_val = (jnp.sum(means_f * means_f * inv_var)
             + jnp.sum(jnp.log(vars_f))
             + C * D * LOG_2PI)                                # scalar

    ab = jnp.zeros((Np, 2), jnp.float32)                       # zero outside z
    ab = ab.at[ZO:ZO + D, 0].set(a_vec)
    ab = ab.at[ZO:ZO + D, 1].set(b_vec)
    c11 = jnp.reshape(c_val, (1, 1)).astype(jnp.float32)

    # ---- kernel -------------------------------------------------------------
    def kernel(x_ref, w_ref, b_ref, ab_ref, c_ref, out_ref):
        # Single fused MXU pass: y = W_cat^T @ x_tile + b  -> [Np, tb]
        y = jnp.dot(w_ref[...], x_ref[...],
                    preferred_element_type=jnp.float32) + b_ref[...]

        # sum_i log_softmax(logits)_i over the C classifier rows.
        logits = y[:C, :]                                        # [C, tb]
        m = jnp.max(logits, axis=0, keepdims=True)               # [1, tb]
        lse = m + jnp.log(jnp.sum(jnp.exp(logits - m), axis=0, keepdims=True))
        pis_sum = jnp.sum(logits, axis=0, keepdims=True) - C * lse  # [1, tb]

        # Class-summed Gaussian log-prob: -0.5 * (z^2 . a - 2 z . b + c).
        # a/b are zero outside the encoder rows, so no slicing of z is needed.
        a_col = ab_ref[:, 0:1]                                   # [Np, 1]
        b_col = ab_ref[:, 1:2]                                   # [Np, 1]
        maha = jnp.sum(y * (y * a_col - 2.0 * b_col),
                       axis=0, keepdims=True)                    # [1, tb]

        out_ref[...] = pis_sum - 0.5 * (maha + c_ref[...])       # [1, tb]

    cost = pl.CostEstimate(
        flops=2 * Np * F * Bp + 8 * Np * Bp,
        transcendentals=(C + 1) * Bp,
        bytes_accessed=4 * (F * Bp + Np * F + 3 * Np + Bp),
    )

    out = pl.pallas_call(
        kernel,
        out_shape=jax.ShapeDtypeStruct((1, Bp), jnp.float32),
        grid=(Bp // tb,),
        in_specs=[
            pl.BlockSpec((F, tb), lambda i: (0, i)),    # x^T tile (lanes=samples)
            pl.BlockSpec((Np, F), lambda i: (0, 0)),    # fused weight (resident)
            pl.BlockSpec((Np, 1), lambda i: (0, 0)),    # fused bias
            pl.BlockSpec((Np, 2), lambda i: (0, 0)),    # [a | b] Gaussian consts
            pl.BlockSpec((1, 1), lambda i: (0, 0)),     # scalar c
        ],
        out_specs=pl.BlockSpec((1, tb), lambda i: (0, i)),   # lane-dense output
        compiler_params=pltpu.CompilerParams(
            dimension_semantics=("parallel",)),
        cost_estimate=cost,
    )(x_t, w_cat_t, b_cat_t, ab, c11)

    return out[0, :B]


def reference_forward(x, w_clf, b_clf, w_enc, b_enc, means, vars_):
    """Plain-JAX reference mirroring the PyTorch forward loop."""
    B = x.shape[0]
    xf = x.reshape(B, -1)
    logits = xf @ w_clf + b_clf
    pis = jax.nn.log_softmax(logits, axis=-1)              # log(clf(x))
    z = xf @ w_enc + b_enc                                  # enc.encode(x_flat)
    D = means.shape[1]
    probs = jnp.zeros(B, dtype=jnp.float32)
    for i in range(means.shape[0]):
        diff = z - means[i]
        lp = -0.5 * (jnp.sum(diff * diff / vars_[i], axis=-1)
                     + jnp.sum(jnp.log(vars_[i]))
                     + D * LOG_2PI)
        probs = probs + pis[:, i] + lp
    return probs


if __name__ == "__main__":
    # Small shapes consistent with the module: batch=16, NCHW 4x16x16 input,
    # n_classes=4, n_dim=32.
    B, C_in, H, W = 16, 4, 16, 16
    n_classes, n_dim = 4, 32
    F = C_in * H * W

    key = jax.random.PRNGKey(0)
    kx, k1, k2, k3, k4, k5, k6 = jax.random.split(key, 7)

    x = jax.random.normal(kx, (B, C_in, H, W), dtype=jnp.float32)

    w_clf = jax.random.normal(k1, (F, n_classes), dtype=jnp.float32) / math.sqrt(F)
    b_clf = 0.01 * jax.random.normal(k2, (n_classes,), dtype=jnp.float32)
    w_enc = jax.random.normal(k3, (F, n_dim), dtype=jnp.float32) / math.sqrt(F)
    b_enc = 0.01 * jax.random.normal(k4, (n_dim,), dtype=jnp.float32)
    means = jax.random.normal(k5, (n_classes, n_dim), dtype=jnp.float32)
    vars_ = jax.random.uniform(k6, (n_classes, n_dim), dtype=jnp.float32,
                               minval=0.5, maxval=1.5)

    probs = generative_classifier_forward(
        x, w_clf, b_clf, w_enc, b_enc, means, vars_)
    probs = jax.block_until_ready(probs)

    ref = reference_forward(x, w_clf, b_clf, w_enc, b_enc, means, vars_)
    assert probs.shape == (B,)
    assert jnp.allclose(probs, ref, rtol=1e-4, atol=1e-3), (probs, ref)

    print("KERNEL_OK")
</pallas_src>

<mosaic_0001>
module attributes {stable_mosaic.version = 11 : i64} {
  func.func @kernel(%arg0: i32, %arg1: memref<1024x16xf32, #tpu.memory_space<vmem>>, %arg2: memref<128x1024xf32, #tpu.memory_space<vmem>>, %arg3: memref<128x1xf32, #tpu.memory_space<vmem>>, %arg4: memref<128x2xf32, #tpu.memory_space<vmem>>, %arg5: memref<1x1xf32, #tpu.memory_space<vmem>>, %arg6: memref<1x16xf32, #tpu.memory_space<vmem>>) attributes {dimension_semantics = [#tpu.dimension_semantics<parallel>], iteration_bounds = array<i64: 1>, scalar_prefetch = 0 : i64, scratch_operands = 0 : i64, tpu.core_type = #tpu.core_type<tc>, window_params = [{transform_indices = @transform_0, window_bounds = array<i64: 1024, 16>}, {pipeline_mode = #tpu.pipeline_mode<synchronous>, transform_indices = @transform_1, window_bounds = array<i64: 128, 1024>}, {pipeline_mode = #tpu.pipeline_mode<synchronous>, transform_indices = @transform_2, window_bounds = array<i64: 128, 1>}, {pipeline_mode = #tpu.pipeline_mode<synchronous>, transform_indices = @transform_3, window_bounds = array<i64: 128, 2>}, {pipeline_mode = #tpu.pipeline_mode<synchronous>, transform_indices = @transform_4, window_bounds = array<i64: 1, 1>}, {transform_indices = @transform_5, window_bounds = array<i64: 1, 16>}]} {
    %c0 = arith.constant 0 : index
    %c0_0 = arith.constant 0 : index
    %0 = vector.load %arg2[%c0, %c0_0] : memref<128x1024xf32, #tpu.memory_space<vmem>>, vector<128x1024xf32>
    %c0_1 = arith.constant 0 : index
    %c0_2 = arith.constant 0 : index
    %1 = vector.load %arg1[%c0_1, %c0_2] : memref<1024x16xf32, #tpu.memory_space<vmem>>, vector<1024x16xf32>
    %cst = arith.constant dense<0.000000e+00> : vector<128x16xf32>
    %2 = tpu.matmul %0, %1, %cst {dimension_numbers = #tpu.dot_dimension_numbers<[1], [0], [0], [1], [0, 0, 1, 1], [], []>} : vector<128x1024xf32>, vector<1024x16xf32>, vector<128x16xf32> -> vector<128x16xf32>
    %c0_3 = arith.constant 0 : index
    %c0_4 = arith.constant 0 : index
    %3 = vector.load %arg3[%c0_3, %c0_4] : memref<128x1xf32, #tpu.memory_space<vmem>>, vector<128x1xf32>
    %4 = vector.broadcast %3 : vector<128x1xf32> to vector<128x16xf32>
    %5 = arith.addf %2, %4 : vector<128x16xf32>
    %6 = vector.extract_strided_slice %5 {offsets = [0, 0], sizes = [4, 16], strides = [1, 1]} : vector<128x16xf32> to vector<4x16xf32>
    %cst_5 = arith.constant dense<0xFF800000> : vector<16xf32>
    %7 = vector.multi_reduction <maximumf>, %6, %cst_5 [0] : vector<4x16xf32> to vector<16xf32>
    %8 = vector.shape_cast %7 : vector<16xf32> to vector<1x16xf32>
    %9 = vector.broadcast %8 : vector<1x16xf32> to vector<4x16xf32>
    %10 = arith.subf %6, %9 : vector<4x16xf32>
    %11 = math.exp %10 : vector<4x16xf32>
    %cst_6 = arith.constant dense<0.000000e+00> : vector<16xf32>
    %12 = vector.multi_reduction <add>, %11, %cst_6 [0] : vector<4x16xf32> to vector<16xf32>
    %13 = vector.shape_cast %12 : vector<16xf32> to vector<1x16xf32>
    %14 = math.log %13 : vector<1x16xf32>
    %15 = arith.addf %8, %14 : vector<1x16xf32>
    %cst_7 = arith.constant dense<0.000000e+00> : vector<16xf32>
    %16 = vector.multi_reduction <add>, %6, %cst_7 [0] : vector<4x16xf32> to vector<16xf32>
    %17 = vector.shape_cast %16 : vector<16xf32> to vector<1x16xf32>
    %cst_8 = arith.constant 4.000000e+00 : f32
    %18 = vector.broadcast %cst_8 : f32 to vector<1x16xf32>
    %19 = arith.mulf %18, %15 : vector<1x16xf32>
    %20 = arith.subf %17, %19 : vector<1x16xf32>
    %c0_9 = arith.constant 0 : index
    %c0_10 = arith.constant 0 : index
    %21 = vector.load %arg4[%c0_9, %c0_10] : memref<128x2xf32, #tpu.memory_space<vmem>>, vector<128x1xf32>
    %c0_11 = arith.constant 0 : index
    %c1 = arith.constant 1 : index
    %22 = vector.load %arg4[%c0_11, %c1] : memref<128x2xf32, #tpu.memory_space<vmem>>, vector<128x1xf32>
    %23 = vector.broadcast %21 : vector<128x1xf32> to vector<128x16xf32>
    %24 = arith.mulf %5, %23 : vector<128x16xf32>
    %cst_12 = arith.constant 2.000000e+00 : f32
    %25 = vector.broadcast %cst_12 : f32 to vector<128x1xf32>
    %26 = arith.mulf %25, %22 : vector<128x1xf32>
    %27 = vector.broadcast %26 : vector<128x1xf32> to vector<128x16xf32>
    %28 = arith.subf %24, %27 : vector<128x16xf32>
    %29 = arith.mulf %5, %28 : vector<128x16xf32>
    %cst_13 = arith.constant dense<0.000000e+00> : vector<16xf32>
    %30 = vector.multi_reduction <add>, %29, %cst_13 [0] : vector<128x16xf32> to vector<16xf32>
    %31 = vector.shape_cast %30 : vector<16xf32> to vector<1x16xf32>
    %c0_14 = arith.constant 0 : index
    %c0_15 = arith.constant 0 : index
    %32 = vector.load %arg5[%c0_14, %c0_15] : memref<1x1xf32, #tpu.memory_space<vmem>>, vector<1x1xf32>
    %33 = vector.broadcast %32 : vector<1x1xf32> to vector<1x16xf32>
    %34 = arith.addf %31, %33 : vector<1x16xf32>
    %cst_16 = arith.constant 5.000000e-01 : f32
    %35 = vector.broadcast %cst_16 : f32 to vector<1x16xf32>
    %36 = arith.mulf %35, %34 : vector<1x16xf32>
    %37 = arith.subf %20, %36 : vector<1x16xf32>
    %c0_17 = arith.constant 0 : index
    %c0_18 = arith.constant 0 : index
    %38 = vector.load %arg6[%c0_17, %c0_18] : memref<1x16xf32, #tpu.memory_space<vmem>>, vector<1x16xf32>
    tpu.vector_store %arg6[%c0_17, %c0_18], %37 {strides = array<i32>} : memref<1x16xf32, #tpu.memory_space<vmem>>, vector<1x16xf32>,
    return
  }
  func.func @transform_0(%arg0: i32) -> (i32, i32) {
    %c0_i32 = arith.constant 0 : i32
    %c0_i32_0 = arith.constant 0 : i32
    return %c0_i32, %arg0 : i32, i32
  }
  func.func @transform_1(%arg0: i32) -> (i32, i32) {
    %c0_i32 = arith.constant 0 : i32
    %c0_i32_0 = arith.constant 0 : i32
    %c0_i32_1 = arith.constant 0 : i32
    return %c0_i32, %c0_i32_0 : i32, i32
  }
  func.func @transform_2(%arg0: i32) -> (i32, i32) {
    %c0_i32 = arith.constant 0 : i32
    %c0_i32_0 = arith.constant 0 : i32
    %c0_i32_1 = arith.constant 0 : i32
    return %c0_i32, %c0_i32_0 : i32, i32
  }
  func.func @transform_3(%arg0: i32) -> (i32, i32) {
    %c0_i32 = arith.constant 0 : i32
    %c0_i32_0 = arith.constant 0 : i32
    %c0_i32_1 = arith.constant 0 : i32
    return %c0_i32, %c0_i32_0 : i32, i32
  }
  func.func @transform_4(%arg0: i32) -> (i32, i32) {
    %c0_i32 = arith.constant 0 : i32
    %c0_i32_0 = arith.constant 0 : i32
    %c0_i32_1 = arith.constant 0 : i32
    return %c0_i32, %c0_i32_0 : i32, i32
  }
  func.func @transform_5(%arg0: i32) -> (i32, i32) {
    %c0_i32 = arith.constant 0 : i32
    %c0_i32_0 = arith.constant 0 : i32
    return %c0_i32, %arg0 : i32, i32
  }
}

</mosaic_0001>

<bundles_post_ra>
// kernel: tpu_custom_call.1
= control target key start
LH: loop header
LB: loop body
LE: loop exit
PB: predicated region body
PF: predicated region fallthrough
CT: control target
= control target key end

     0   :  { %s2749_s0 = inlined_call_operand.vmem [shape: f32[1024,16], index: 0, kind: input, shape index: {}]   ;;  %s2750_s1 = inlined_call_operand.vmem [shape: f32[128,1024], index: 1, kind: input, shape index: {}]   ;;  %s2751_s2 = inlined_call_operand.vmem [shape: f32[128,1], index: 2, kind: input, shape index: {}]   ;;  %s2752_s3 = inlined_call_operand.vmem [shape: f32[128,2], index: 3, kind: input, shape index: {}]   ;;  %s2753_s4 = inlined_call_operand.<no memory space> [shape: f32[1,1], index: 4, kind: input, shape index: {}]   ;;  %s2754_s5 = inlined_call_operand.hbm [shape: f32[1,16], index: 5, kind: output, shape index: {}]  }
   0x1   :  { %v10_v0 = vstv %s2753_s4 }
   0x2   :  { %11 = vst [vmem:[#allocation2] sm:$0x1] %v10_v0 }
   0x3   :  { %v182_v1 = vld [vmem:[%s2749_s0 + $0xf8] sm:$0xff]  ;;  %v181_v4 = vld [vmem:[%s2749_s0 + $0xf0] sm:$0xff]  ;;  %v180_v8 = vld [vmem:[%s2749_s0 + $0xe8] sm:$0xff] }
   0x4   :  { %v166_v2 = vld [vmem:[%s2749_s0 + $0x78] sm:$0xff]  ;;  %1292 = vmatprep.subr.mxu0 %v182_v1  ;;  %v165_v6 = vld [vmem:[%s2749_s0 + $0x70] sm:$0xff]  ;;  %v164_v10 = vld [vmem:[%s2749_s0 + $0x68] sm:$0xff] }
   0x5   :  { %v214_v3 = vld [vmem:[%s2749_s0 + $0x1f8] sm:$0xff]  ;;  %1293 = vmatpush3.msra.mxu0 %v166_v2  ;;  %v213_v7 = vld [vmem:[%s2749_s0 + $0x1f0] sm:$0xff]  ;;  %v212_v11 = vld [vmem:[%s2749_s0 + $0x1e8] sm:$0xff] }
   0x6   :  { %1372 = vmatprep.subr.mxu1 %v214_v3  ;;  %v198_v5 = vld [vmem:[%s2749_s0 + $0x178] sm:$0xff]  ;;  %v197_v9 = vld [vmem:[%s2749_s0 + $0x170] sm:$0xff]  ;;  %1294 = vmatprep.subr.mxu0 %v181_v4  ;;  %v179_v12 = vld [vmem:[%s2749_s0 + $0xe0] sm:$0xff] }
   0x7   :  { %1373 = vmatpush3.msra.mxu1 %v198_v5  ;;  %1295 = vmatpush3.msra.mxu0 %v165_v6  ;;  %v196_v13 = vld [vmem:[%s2749_s0 + $0x168] sm:$0xff]  ;;  %v211_v14 = vld [vmem:[%s2749_s0 + $0x1e0] sm:$0xff]  ;;  %v178_v17 = vld [vmem:[%s2749_s0 + $0xd8] sm:$0xff] }
   0x8   :  { %1374 = vmatprep.subr.mxu1 %v213_v7  ;;  %1296 = vmatprep.subr.mxu0 %v180_v8  ;;  %v163_v15 = vld [vmem:[%s2749_s0 + $0x60] sm:$0xff]  ;;  %v210_v18 = vld [vmem:[%s2749_s0 + $0x1d8] sm:$0xff]  ;;  %v177_v21 = vld [vmem:[%s2749_s0 + $0xd0] sm:$0xff] }
   0x9   :  { %1375 = vmatpush3.msra.mxu1 %v197_v9  ;;  %v195_v16 = vld [vmem:[%s2749_s0 + $0x160] sm:$0xff]  ;;  %1297 = vmatpush3.msra.mxu0 %v164_v10  ;;  %v162_v19 = vld [vmem:[%s2749_s0 + $0x58] sm:$0xff]  ;;  %v209_v22 = vld [vmem:[%s2749_s0 + $0x1d0] sm:$0xff] }
   0xa   :  { %1376 = vmatprep.subr.mxu1 %v212_v11  ;;  %1298 = vmatprep.subr.mxu0 %v179_v12  ;;  %v194_v20 = vld [vmem:[%s2749_s0 + $0x158] sm:$0xff]  ;;  %v161_v23 = vld [vmem:[%s2749_s0 + $0x50] sm:$0xff]  ;;  %v176_v25 = vld [vmem:[%s2749_s0 + $0xc8] sm:$0xff] }
   0xb   :  { %1377 = vmatpush3.msra.mxu1 %v196_v13  ;;  %1299 = vmatpush3.msra.mxu0 %v163_v15  ;;  %v193_v24 = vld [vmem:[%s2749_s0 + $0x150] sm:$0xff]  ;;  %v208_v26 = vld [vmem:[%s2749_s0 + $0x1c8] sm:$0xff]  ;;  %v175_v29 = vld [vmem:[%s2749_s0 + $0xc0] sm:$0xff] }
   0xc   :  { %1378 = vmatprep.subr.mxu1 %v211_v14  ;;  %1300 = vmatprep.subr.mxu0 %v178_v17  ;;  %v160_v27 = vld [vmem:[%s2749_s0 + $0x48] sm:$0xff]  ;;  %v207_v30 = vld [vmem:[%s2749_s0 + $0x1c0] sm:$0xff]  ;;  %v174_v33 = vld [vmem:[%s2749_s0 + $0xb8] sm:$0xff] }
   0xd   :  { %1379 = vmatpush3.msra.mxu1 %v195_v16  ;;  %1301 = vmatpush3.msra.mxu0 %v162_v19  ;;  %v192_v28 = vld [vmem:[%s2749_s0 + $0x148] sm:$0xff]  ;;  %v159_v31 = vld [vmem:[%s2749_s0 + $0x40] sm:$0xff]  ;;  %v206_v34 = vld [vmem:[%s2749_s0 + $0x1b8] sm:$0xff] }
   0xe   :  { %1380 = vmatprep.subr.mxu1 %v210_v18  ;;  %1302 = vmatprep.subr.mxu0 %v177_v21  ;;  %v191_v32 = vld [vmem:[%s2749_s0 + $0x140] sm:$0xff]  ;;  %v158_v35 = vld [vmem:[%s2749_s0 + $0x38] sm:$0xff]  ;;  %v173_v37 = vld [vmem:[%s2749_s0 + $0xb0] sm:$0xff] }
   0xf   :  { %1381 = vmatpush3.msra.mxu1 %v194_v20  ;;  %1303 = vmatpush3.msra.mxu0 %v161_v23  ;;  %v190_v36 = vld [vmem:[%s2749_s0 + $0x138] sm:$0xff]  ;;  %v205_v38 = vld [vmem:[%s2749_s0 + $0x1b0] sm:$0xff]  ;;  %v172_v41 = vld [vmem:[%s2749_s0 + $0xa8] sm:$0xff] }
  0x10   :  { %1382 = vmatprep.subr.mxu1 %v209_v22  ;;  %1304 = vmatprep.subr.mxu0 %v176_v25  ;;  %v157_v39 = vld [vmem:[%s2749_s0 + $0x30] sm:$0xff]  ;;  %v204_v42 = vld [vmem:[%s2749_s0 + $0x1a8] sm:$0xff]  ;;  %v171_v45 = vld [vmem:[%s2749_s0 + $0xa0] sm:$0xff] }
  0x11   :  { %1383 = vmatpush3.msra.mxu1 %v193_v24  ;;  %1305 = vmatpush3.msra.mxu0 %v160_v27  ;;  %v189_v40 = vld [vmem:[%s2749_s0 + $0x130] sm:$0xff]  ;;  %v156_v43 = vld [vmem:[%s2749_s0 + $0x28] sm:$0xff]  ;;  %v203_v46 = vld [vmem:[%s2749_s0 + $0x1a0] sm:$0xff] }
  0x12   :  { %1384 = vmatprep.subr.mxu1 %v208_v26  ;;  %1306 = vmatprep.subr.mxu0 %v175_v29  ;;  %v188_v44 = vld [vmem:[%s2749_s0 + $0x128] sm:$0xff]  ;;  %v155_v47 = vld [vmem:[%s2749_s0 + $0x20] sm:$0xff]  ;;  %v170_v49 = vld [vmem:[%s2749_s0 + $0x98] sm:$0xff] }
  0x13   :  { %1385 = vmatpush3.msra.mxu1 %v192_v28  ;;  %1307 = vmatpush3.msra.mxu0 %v159_v31  ;;  %v187_v48 = vld [vmem:[%s2749_s0 + $0x120] sm:$0xff]  ;;  %v202_v50 = vld [vmem:[%s2749_s0 + $0x198] sm:$0xff]  ;;  %v169_v53 = vld [vmem:[%s2749_s0 + $0x90] sm:$0xff] }
  0x14   :  { %1386 = vmatprep.subr.mxu1 %v207_v30  ;;  %1308 = vmatprep.subr.mxu0 %v174_v33  ;;  %v154_v51 = vld [vmem:[%s2749_s0 + $0x18] sm:$0xff]  ;;  %v201_v54 = vld [vmem:[%s2749_s0 + $0x190] sm:$0xff]  ;;  %v168_v57 = vld [vmem:[%s2749_s0 + $0x88] sm:$0xff] }
  0x15   :  { %1387 = vmatpush3.msra.mxu1 %v191_v32  ;;  %1309 = vmatpush3.msra.mxu0 %v158_v35  ;;  %v186_v52 = vld [vmem:[%s2749_s0 + $0x118] sm:$0xff]  ;;  %v153_v55 = vld [vmem:[%s2749_s0 + $0x10] sm:$0xff]  ;;  %v200_v58 = vld [vmem:[%s2749_s0 + $0x188] sm:$0xff] }
  0x16   :  { %1388 = vmatprep.subr.mxu1 %v206_v34  ;;  %1310 = vmatprep.subr.mxu0 %v173_v37  ;;  %v185_v56 = vld [vmem:[%s2749_s0 + $0x110] sm:$0xff]  ;;  %v152_v59 = vld [vmem:[%s2749_s0 + $0x8] sm:$0xff]  ;;  %v167_v61 = vld [vmem:[%s2749_s0 + $0x80] sm:$0xff] }
  0x17   :  { %1389 = vmatpush3.msra.mxu1 %v190_v36  ;;  %1311 = vmatpush3.msra.mxu0 %v157_v39  ;;  %v184_v60 = vld [vmem:[%s2749_s0 + $0x108] sm:$0xff]  ;;  %v151_v63 = vld [vmem:[%s2749_s0] sm:$0xff]  ;;  %v26_v3 = vld [vmem:[%s2750_s1 + $0x18] sm:$0xff] }
  0x18   :  { %1390 = vmatprep.subr.mxu1 %v205_v38  ;;  %1312 = vmatprep.subr.mxu0 %v172_v41  ;;  %v24_v62 = vld [vmem:[%s2750_s1 + $0x8] sm:$0xff]  ;;  %v199_v0 = vld [vmem:[%s2749_s0 + $0x180] sm:$0xff]  ;;  %v246_v4 = vld [vmem:[%s2749_s0 + $0x2f8] sm:$0xff] }
  0x19   :  { %1391 = vmatpush3.msra.mxu1 %v189_v40  ;;  %1313 = vmatpush3.msra.mxu0 %v156_v43  ;;  %v23_v1 = vld [vmem:[%s2750_s1] sm:$0xff]  ;;  %v25_v5 = vld [vmem:[%s2750_s1 + $0x10] sm:$0xff]  ;;  %v230_v6 = vld [vmem:[%s2749_s0 + $0x278] sm:$0xff] }
  0x1a   :  { %1392 = vmatprep.subr.mxu1 %v204_v42  ;;  %1314 = vmatprep.subr.mxu0 %v171_v45  ;;  %v183_v2 = vld [vmem:[%s2749_s0 + $0x100] sm:$0xff]  ;;  %v278_v7 = vld [vmem:[%s2749_s0 + $0x3f8] sm:$0xff]  ;;  %v32_v8 = vld [vmem:[%s2750_s1 + $0x48] sm:$0xff] }
  0x1b   :  { %1393 = vmatpush3.msra.mxu1 %v188_v44  ;;  %1315 = vmatpush3.msra.mxu0 %v155_v47  ;;  %v262_v9 = vld [vmem:[%s2749_s0 + $0x378] sm:$0xff]  ;;  %v31_v10 = vld [vmem:[%s2750_s1 + $0x40] sm:$0xff]  ;;  %v245_v12 = vld [vmem:[%s2749_s0 + $0x2f0] sm:$0xff] }
  0x1c   :  { %1394 = vmatprep.subr.mxu1 %v203_v46  ;;  %1316 = vmatprep.subr.mxu0 %v170_v49  ;;  %v34_v11 = vld [vmem:[%s2750_s1 + $0x58] sm:$0xff]  ;;  %v33_v13 = vld [vmem:[%s2750_s1 + $0x50] sm:$0xff]  ;;  %v40_v16 = vld [vmem:[%s2750_s1 + $0x88] sm:$0xff] }
  0x1d   :  { %1395 = vmatpush3.msra.mxu1 %v187_v48  ;;  %1317 = vmatpush3.msra.mxu0 %v154_v51  ;;  %v229_v14 = vld [vmem:[%s2749_s0 + $0x270] sm:$0xff]  ;;  %v39_v18 = vld [vmem:[%s2750_s1 + $0x80] sm:$0xff]  ;;  %v42_v19 = vld [vmem:[%s2750_s1 + $0x98] sm:$0xff] }
  0x1e   :  { %1396 = vmatprep.subr.mxu1 %v202_v50  ;;  %1318 = vmatprep.subr.mxu0 %v169_v53  ;;  %v277_v15 = vld [vmem:[%s2749_s0 + $0x3f0] sm:$0xff]  ;;  %v244_v20 = vld [vmem:[%s2749_s0 + $0x2e8] sm:$0xff]  ;;  %v47_v26 = vld [vmem:[%s2750_s1 + $0xc0] sm:$0xff] }
  0x1f   :  { %1397 = vmatpush3.msra.mxu1 %v186_v52  ;;  %1319 = vmatpush3.msra.mxu0 %v153_v55  ;;  %v261_v17 = vld [vmem:[%s2749_s0 + $0x370] sm:$0xff]  ;;  %v228_v22 = vld [vmem:[%s2749_s0 + $0x268] sm:$0xff]  ;;  %v50_v27 = vld [vmem:[%s2750_s1 + $0xd8] sm:$0xff] }
  0x20   :  { %1398 = vmatprep.subr.mxu1 %v201_v54  ;;  %1320 = vmatprep.subr.mxu0 %v168_v57  ;;  %v41_v21 = vld [vmem:[%s2750_s1 + $0x90] sm:$0xff]  ;;  %v276_v23 = vld [vmem:[%s2749_s0 + $0x3e8] sm:$0xff]  ;;  %v243_v28 = vld [vmem:[%s2749_s0 + $0x2e0] sm:$0xff] }
  0x21   :  { %1399 = vmatpush3.msra.mxu1 %v185_v56  ;;  %1321 = vmatpush3.msra.mxu0 %v152_v59  ;;  %v48_v24 = vld [vmem:[%s2750_s1 + $0xc8] sm:$0xff]  ;;  %v49_v29 = vld [vmem:[%s2750_s1 + $0xd0] sm:$0xff]  ;;  %v227_v30 = vld [vmem:[%s2749_s0 + $0x260] sm:$0xff] }
  0x22   :  { %1400 = vmatprep.subr.mxu1 %v200_v58  ;;  %1322 = vmatprep.subr.mxu0 %v167_v61  ;;  %v260_v25 = vld [vmem:[%s2749_s0 + $0x368] sm:$0xff]  ;;  %v275_v31 = vld [vmem:[%s2749_s0 + $0x3e0] sm:$0xff]  ;;  %v58_v35 = vld [vmem:[%s2750_s1 + $0x118] sm:$0xff] }
  0x23   :  { %1401 = vmatpush3.msra.mxu1 %v184_v60  ;;  %439 = vmatprep.mubr.f32.mxu0 %v24_v62  ;;  %v56_v32 = vld [vmem:[%s2750_s1 + $0x108] sm:$0xff]  ;;  %v259_v33 = vld [vmem:[%s2749_s0 + $0x360] sm:$0xff]  ;;  %v242_v36 = vld [vmem:[%s2749_s0 + $0x2d8] sm:$0xff] }
  0x24   :  { %1323 = vmatpush3.msra.mxu0 %v151_v63  ;;  %1402 = vmatprep.subr.mxu1 %v199_v0  ;;  %v55_v34 = vld [vmem:[%s2750_s1 + $0x100] sm:$0xff]  ;;  %v57_v37 = vld [vmem:[%s2750_s1 + $0x110] sm:$0xff]  ;;  %v226_v38 = vld [vmem:[%s2749_s0 + $0x258] sm:$0xff] }
  0x25   :  { %440 = vmatmul.mubr.f32.vlgmr.msra.gmra.mxu0 %v23_v1  ;;  %1403 = vmatpush3.msra.mxu1 %v183_v2  ;;  %v274_v39 = vld [vmem:[%s2749_s0 + $0x3d8] sm:$0xff]  ;;  %v64_v40 = vld [vmem:[%s2750_s1 + $0x148] sm:$0xff]  ;;  %v63_v42 = vld [vmem:[%s2750_s1 + $0x140] sm:$0xff] }
  0x26   :  { %584 = vmatprep.mubr.f32.mxu1 %v26_v3  ;;  %1452 = vmatprep.subr.mxu0 %v246_v4  ;;  %v258_v41 = vld [vmem:[%s2749_s0 + $0x358] sm:$0xff]  ;;  %v241_v44 = vld [vmem:[%s2749_s0 + $0x2d0] sm:$0xff]  ;;  %v72_v48 = vld [vmem:[%s2750_s1 + $0x188] sm:$0xff] }
  0x27   :  { %585 = vmatmul.mubr.f32.vlgmr.msra.gmra.mxu1 %v25_v5  ;;  %1453 = vmatpush3.msra.mxu0 %v230_v6  ;;  %v66_v43 = vld [vmem:[%s2750_s1 + $0x158] sm:$0xff]  ;;  %v65_v45 = vld [vmem:[%s2750_s1 + $0x150] sm:$0xff]  ;;  %v71_v50 = vld [vmem:[%s2750_s1 + $0x180] sm:$0xff] }
  0x28   :  { %1532 = vmatprep.subr.mxu1 %v278_v7  ;;  %444 = vmatprep.mubr.f32.mxu0 %v32_v8  ;;  %v225_v46 = vld [vmem:[%s2749_s0 + $0x250] sm:$0xff]  ;;  %v74_v51 = vld [vmem:[%s2750_s1 + $0x198] sm:$0xff]  ;;  %v240_v52 = vld [vmem:[%s2749_s0 + $0x2c8] sm:$0xff] }
  0x29   :  { %1533 = vmatpush3.msra.mxu1 %v262_v9  ;;  %445 = vmatmul.mubr.f32.gmra.mxu0 %v31_v10  ;;  %v273_v47 = vld [vmem:[%s2749_s0 + $0x3d0] sm:$0xff]  ;;  %v224_v54 = vld [vmem:[%s2749_s0 + $0x248] sm:$0xff]  ;;  %v79_v58 = vld [vmem:[%s2750_s1 + $0x1c0] sm:$0xff] }
  0x2a   :  { %589 = vmatprep.mubr.f32.mxu1 %v34_v11  ;;  %1454 = vmatprep.subr.mxu0 %v245_v12  ;;  %v257_v49 = vld [vmem:[%s2749_s0 + $0x350] sm:$0xff]  ;;  %v272_v55 = vld [vmem:[%s2749_s0 + $0x3c8] sm:$0xff]  ;;  %v82_v59 = vld [vmem:[%s2750_s1 + $0x1d8] sm:$0xff] }
  0x2b   :  { %590 = vmatmul.mubr.f32.gmra.mxu1 %v33_v13  ;;  %1455 = vmatpush3.msra.mxu0 %v229_v14  ;;  %v73_v53 = vld [vmem:[%s2750_s1 + $0x190] sm:$0xff]  ;;  %v80_v56 = vld [vmem:[%s2750_s1 + $0x1c8] sm:$0xff]  ;;  %v239_v60 = vld [vmem:[%s2749_s0 + $0x2c0] sm:$0xff] }
  0x2c   :  { %1534 = vmatprep.subr.mxu1 %v277_v15  ;;  %449 = vmatprep.mubr.f32.mxu0 %v40_v16  ;;  %v256_v57 = vld [vmem:[%s2749_s0 + $0x348] sm:$0xff]  ;;  %v81_v61 = vld [vmem:[%s2750_s1 + $0x1d0] sm:$0xff]  ;;  %v223_v62 = vld [vmem:[%s2749_s0 + $0x240] sm:$0xff] }
  0x2d   :  { %1535 = vmatpush3.msra.mxu1 %v261_v17  ;;  %450 = vmatmul.mubr.f32.gmra.mxu0 %v39_v18  ;;  %v271_v63 = vld [vmem:[%s2749_s0 + $0x3c0] sm:$0xff]  ;;  %v88_v0 = vld [vmem:[%s2750_s1 + $0x208] sm:$0xff]  ;;  %v90_v3 = vld [vmem:[%s2750_s1 + $0x218] sm:$0xff] }
  0x2e   :  { %594 = vmatprep.mubr.f32.mxu1 %v42_v19  ;;  %1456 = vmatprep.subr.mxu0 %v244_v20  ;;  %v255_v1 = vld [vmem:[%s2749_s0 + $0x340] sm:$0xff]  ;;  %v238_v4 = vld [vmem:[%s2749_s0 + $0x2b8] sm:$0xff]  ;;  %v89_v5 = vld [vmem:[%s2750_s1 + $0x210] sm:$0xff] }
  0x2f   :  { %595 = vmatmul.mubr.f32.gmra.mxu1 %v41_v21  ;;  %1457 = vmatpush3.msra.mxu0 %v228_v22  ;;  %v87_v2 = vld [vmem:[%s2750_s1 + $0x200] sm:$0xff]  ;;  %v222_v6 = vld [vmem:[%s2749_s0 + $0x238] sm:$0xff]  ;;  %v96_v8 = vld [vmem:[%s2750_s1 + $0x248] sm:$0xff] }
  0x30   :  { %1536 = vmatprep.subr.mxu1 %v276_v23  ;;  %454 = vmatprep.mubr.f32.mxu0 %v48_v24  ;;  %v270_v7 = vld [vmem:[%s2749_s0 + $0x3b8] sm:$0xff]  ;;  %v95_v10 = vld [vmem:[%s2750_s1 + $0x240] sm:$0xff]  ;;  %v237_v12 = vld [vmem:[%s2749_s0 + $0x2b0] sm:$0xff] }
  0x31   :  { %1537 = vmatpush3.msra.mxu1 %v260_v25  ;;  %455 = vmatmul.mubr.f32.gmra.mxu0 %v47_v26  ;;  %v254_v9 = vld [vmem:[%s2749_s0 + $0x338] sm:$0xff]  ;;  %v97_v13 = vld [vmem:[%s2750_s1 + $0x250] sm:$0xff]  ;;  %v104_v16 = vld [vmem:[%s2750_s1 + $0x288] sm:$0xff] }
  0x32   :  { %599 = vmatprep.mubr.f32.mxu1 %v50_v27  ;;  %1458 = vmatprep.subr.mxu0 %v243_v28  ;;  %v98_v11 = vld [vmem:[%s2750_s1 + $0x258] sm:$0xff]  ;;  %v221_v14 = vld [vmem:[%s2749_s0 + $0x230] sm:$0xff]  ;;  %v103_v18 = vld [vmem:[%s2750_s1 + $0x280] sm:$0xff] }
  0x33   :  { %600 = vmatmul.mubr.f32.gmra.mxu1 %v49_v29  ;;  %1459 = vmatpush3.msra.mxu0 %v227_v30  ;;  %v269_v15 = vld [vmem:[%s2749_s0 + $0x3b0] sm:$0xff]  ;;  %v106_v19 = vld [vmem:[%s2750_s1 + $0x298] sm:$0xff]  ;;  %v236_v20 = vld [vmem:[%s2749_s0 + $0x2a8] sm:$0xff] }
  0x34   :  { %1538 = vmatprep.subr.mxu1 %v275_v31  ;;  %459 = vmatprep.mubr.f32.mxu0 %v56_v32  ;;  %v253_v17 = vld [vmem:[%s2749_s0 + $0x330] sm:$0xff]  ;;  %v220_v22 = vld [vmem:[%s2749_s0 + $0x228] sm:$0xff]  ;;  %v111_v26 = vld [vmem:[%s2750_s1 + $0x2c0] sm:$0xff] }
  0x35   :  { %1539 = vmatpush3.msra.mxu1 %v259_v33  ;;  %460 = vmatmul.mubr.f32.gmra.mxu0 %v55_v34  ;;  %v105_v21 = vld [vmem:[%s2750_s1 + $0x290] sm:$0xff]  ;;  %v268_v23 = vld [vmem:[%s2749_s0 + $0x3a8] sm:$0xff]  ;;  %v114_v27 = vld [vmem:[%s2750_s1 + $0x2d8] sm:$0xff] }
  0x36   :  { %604 = vmatprep.mubr.f32.mxu1 %v58_v35  ;;  %1460 = vmatprep.subr.mxu0 %v242_v36  ;;  %v112_v24 = vld [vmem:[%s2750_s1 + $0x2c8] sm:$0xff]  ;;  %v235_v28 = vld [vmem:[%s2749_s0 + $0x2a0] sm:$0xff]  ;;  %v113_v29 = vld [vmem:[%s2750_s1 + $0x2d0] sm:$0xff] }
  0x37   :  { %605 = vmatmul.mubr.f32.gmra.mxu1 %v57_v37  ;;  %1461 = vmatpush3.msra.mxu0 %v226_v38  ;;  %v252_v25 = vld [vmem:[%s2749_s0 + $0x328] sm:$0xff]  ;;  %v219_v30 = vld [vmem:[%s2749_s0 + $0x220] sm:$0xff]  ;;  %v122_v35 = vld [vmem:[%s2750_s1 + $0x318] sm:$0xff]  ;;  %v1656_v38 = vmov 0  }
  0x38   :  { %1540 = vmatprep.subr.mxu1 %v274_v39  ;;  %464 = vmatprep.mubr.f32.mxu0 %v64_v40  ;;  %v267_v31 = vld [vmem:[%s2749_s0 + $0x3a0] sm:$0xff]  ;;  %v120_v32 = vld [vmem:[%s2750_s1 + $0x308] sm:$0xff]  ;;  %v234_v36 = vld [vmem:[%s2749_s0 + $0x298] sm:$0xff] }
  0x39   :  { %1541 = vmatpush3.msra.mxu1 %v258_v41  ;;  %465 = vmatmul.mubr.f32.gmra.mxu0 %v63_v42  ;;  %v251_v33 = vld [vmem:[%s2749_s0 + $0x320] sm:$0xff]  ;;  %v281_v37 = vld [vmem:[%s2751_s2 + $0x10] sm:$0xff]  ;;  %v218_v40 = vld [vmem:[%s2749_s0 + $0x218] sm:$0xff] }
  0x3a   :  { %609 = vmatprep.mubr.f32.mxu1 %v66_v43  ;;  %1462 = vmatprep.subr.mxu0 %v241_v44  ;;  %v119_v34 = vld [vmem:[%s2750_s1 + $0x300] sm:$0xff]  ;;  %v121_v39 = vld [vmem:[%s2750_s1 + $0x310] sm:$0xff]  ;;  %v266_v41 = vld [vmem:[%s2749_s0 + $0x398] sm:$0xff] }
  0x3b   :  { %610 = vmatmul.mubr.f32.gmra.mxu1 %v65_v45  ;;  %1463 = vmatpush3.msra.mxu0 %v225_v46  ;;  %v128_v42 = vld [vmem:[%s2750_s1 + $0x348] sm:$0xff]  ;;  %v250_v43 = vld [vmem:[%s2749_s0 + $0x318] sm:$0xff]  ;;  %v127_v44 = vld [vmem:[%s2750_s1 + $0x340] sm:$0xff] }
  0x3c   :  { %1542 = vmatprep.subr.mxu1 %v273_v47  ;;  %469 = vmatprep.mubr.f32.mxu0 %v72_v48  ;;  %v130_v45 = vld [vmem:[%s2750_s1 + $0x358] sm:$0xff]  ;;  %v233_v46 = vld [vmem:[%s2749_s0 + $0x290] sm:$0xff]  ;;  %v2215_v47 = vld [vmem:[%s2752_s3] sm:$0xff] }
  0x3d   :  { %1543 = vmatpush3.msra.mxu1 %v257_v49  ;;  %470 = vmatmul.mubr.f32.gmra.mxu0 %v71_v50  ;;  %v282_v48 = vld [vmem:[%s2751_s2 + $0x18] sm:$0xff]  ;;  %v129_v49 = vld [vmem:[%s2750_s1 + $0x350] sm:$0xff] }
  0x3e   :  { %614 = vmatprep.mubr.f32.mxu1 %v74_v51  ;;  %1464 = vmatprep.subr.mxu0 %v240_v52  ;;  %v217_v50 = vld [vmem:[%s2749_s0 + $0x210] sm:$0xff]  ;;  %v136_v52 = vld [vmem:[%s2750_s1 + $0x388] sm:$0xff] }
  0x3f   :  { %615 = vmatmul.mubr.f32.gmra.mxu1 %v73_v53  ;;  %1465 = vmatpush3.msra.mxu0 %v224_v54  ;;  %v265_v51 = vld [vmem:[%s2749_s0 + $0x390] sm:$0xff]  ;;  %v1097_v53 = vmul.f32 2.0, %v2215_v47 }
  0x40   :  { %1544 = vmatprep.subr.mxu1 %v272_v55  ;;  %474 = vmatprep.mubr.f32.mxu0 %v80_v56  ;;  %v249_v54 = vld [vmem:[%s2749_s0 + $0x310] sm:$0xff]  ;;  %v135_v55 = vld [vmem:[%s2750_s1 + $0x380] sm:$0xff]  ;;  %v138_v56 = vld [vmem:[%s2750_s1 + $0x398] sm:$0xff] }
  0x41   :  { %1545 = vmatpush3.msra.mxu1 %v256_v57  ;;  %475 = vmatmul.mubr.f32.gmra.mxu0 %v79_v58  ;;  %v2245_v57 = vld [vmem:[%s2752_s3 + $0x20] sm:$0xff]  ;;  %v1657_v58 = vmov 1  }
  0x42   :  { %619 = vmatprep.mubr.f32.mxu1 %v82_v59  ;;  %1466 = vmatprep.subr.mxu0 %v239_v60  ;;  %v232_v59 = vld [vmem:[%s2749_s0 + $0x288] sm:$0xff] }
  0x43   :  { %620 = vmatmul.mubr.f32.gmra.mxu1 %v81_v61  ;;  %1467 = vmatpush3.msra.mxu0 %v223_v62  ;;  %v284_v60 = vld [vmem:[%s2751_s2 + $0x28] sm:$0xff]  ;;  %v137_v61 = vld [vmem:[%s2750_s1 + $0x390] sm:$0xff] }
  0x44   :  { %1546 = vmatprep.subr.mxu1 %v271_v63  ;;  %479 = vmatprep.mubr.f32.mxu0 %v88_v0  ;;  %v216_v62 = vld [vmem:[%s2749_s0 + $0x208] sm:$0xff] }
  0x45   :  { %1547 = vmatpush3.msra.mxu1 %v255_v1  ;;  %480 = vmatmul.mubr.f32.gmra.mxu0 %v87_v2  ;;  %v264_v63 = vld [vmem:[%s2749_s0 + $0x388] sm:$0xff]  ;;  %v1101_v1 = vmul.f32 2.0, %v2245_v57 }
  0x46   :  { %624 = vmatprep.mubr.f32.mxu1 %v90_v3  ;;  %1468 = vmatprep.subr.mxu0 %v238_v4  ;;  %v144_v0 = vld [vmem:[%s2750_s1 + $0x3c8] sm:$0xff]  ;;  %v143_v3 = vld [vmem:[%s2750_s1 + $0x3c0] sm:$0xff]  ;;  %v146_v4 = vld [vmem:[%s2750_s1 + $0x3d8] sm:$0xff] }
  0x47   :  { %625 = vmatmul.mubr.f32.gmra.mxu1 %v89_v5  ;;  %1469 = vmatpush3.msra.mxu0 %v222_v6  ;;  %v248_v2 = vld [vmem:[%s2749_s0 + $0x308] sm:$0xff]  ;;  %v2279_v5 = vld [vmem:[%s2752_s3 + $0x38] sm:$0xff]  ;;  %v231_v6 = vld [vmem:[%s2749_s0 + $0x280] sm:$0xff] }
  0x48   :  { %1548 = vmatprep.subr.mxu1 %v270_v7  ;;  %484 = vmatprep.mubr.f32.mxu0 %v96_v8  ;;  %v286_v7 = vld [vmem:[%s2751_s2 + $0x38] sm:$0xff] }
  0x49   :  { %1549 = vmatpush3.msra.mxu1 %v254_v9  ;;  %485 = vmatmul.mubr.f32.gmra.mxu0 %v95_v10 }
  0x4a   :  { %629 = vmatprep.mubr.f32.mxu1 %v98_v11  ;;  %1470 = vmatprep.subr.mxu0 %v237_v12 }
  0x4b   :  { %630 = vmatmul.mubr.f32.gmra.mxu1 %v97_v13  ;;  %1471 = vmatpush3.msra.mxu0 %v221_v14 }
  0x4c   :  { %1550 = vmatprep.subr.mxu1 %v269_v15  ;;  %489 = vmatprep.mubr.f32.mxu0 %v104_v16 }
  0x4d   :  { %1551 = vmatpush3.msra.mxu1 %v253_v17  ;;  %490 = vmatmul.mubr.f32.gmra.mxu0 %v103_v18 }
  0x4e   :  { %634 = vmatprep.mubr.f32.mxu1 %v106_v19  ;;  %1472 = vmatprep.subr.mxu0 %v236_v20 }
  0x4f   :  { %635 = vmatmul.mubr.f32.gmra.mxu1 %v105_v21  ;;  %1473 = vmatpush3.msra.mxu0 %v220_v22 }
  0x50   :  { %1552 = vmatprep.subr.mxu1 %v268_v23  ;;  %494 = vmatprep.mubr.f32.mxu0 %v112_v24 }
  0x51   :  { %1553 = vmatpush3.msra.mxu1 %v252_v25  ;;  %495 = vmatmul.mubr.f32.gmra.mxu0 %v111_v26 }
  0x52   :  { %639 = vmatprep.mubr.f32.mxu1 %v114_v27  ;;  %1474 = vmatprep.subr.mxu0 %v235_v28 }
  0x53   :  { %640 = vmatmul.mubr.f32.gmra.mxu1 %v113_v29  ;;  %1475 = vmatpush3.msra.mxu0 %v219_v30 }
  0x54   :  { %1554 = vmatprep.subr.mxu1 %v267_v31  ;;  %499 = vmatprep.mubr.f32.mxu0 %v120_v32 }
  0x55   :  { %1555 = vmatpush3.msra.mxu1 %v251_v33  ;;  %1615 = vset.pattern.permute.xlu1 %v1656_v38 }
  0x56   :  { %500 = vmatmul.mubr.f32.gmra.mxu0 %v119_v34  ;;  %644 = vmatprep.mubr.f32.mxu1 %v122_v35 }
  0x57   :  { %1476 = vmatprep.subr.mxu0 %v234_v36  ;;  %307 = vperm.xlu1 %1615, %v281_v37  }
  0x58   :  { %645 = vmatmul.mubr.f32.gmra.mxu1 %v121_v39  ;;  %1477 = vmatpush3.msra.mxu0 %v218_v40 }
  0x59   :  { %1556 = vmatprep.subr.mxu1 %v266_v41  ;;  %504 = vmatprep.mubr.f32.mxu0 %v128_v42 }
  0x5a   :  { %1557 = vmatpush3.msra.mxu1 %v250_v43  ;;  %505 = vmatmul.mubr.f32.gmra.mxu0 %v127_v44 }
  0x5b   :  { %649 = vmatprep.mubr.f32.mxu1 %v130_v45  ;;  %1478 = vmatprep.subr.mxu0 %v233_v46 }
  0x5c   :  { %312 = vperm.xlu1 %1615, %v282_v48   ;;  %650 = vmatmul.mubr.f32.gmra.mxu1 %v129_v49 }
  0x5d   :  { %1479 = vmatpush3.msra.mxu0 %v217_v50  ;;  %1558 = vmatprep.subr.mxu1 %v265_v51 }
  0x5e   :  { %1616 = vset.pattern.permute.xlu0 %v1657_v58  ;;  %509 = vmatprep.mubr.f32.mxu0 %v136_v52 }
  0x5f   :  { %1559 = vmatpush3.msra.mxu1 %v249_v54  ;;  %1115 = vperm.xlu0 %1616, %v1097_v53  }
  0x60   :  { %510 = vmatmul.mubr.f32.gmra.mxu0 %v135_v55  ;;  %654 = vmatprep.mubr.f32.mxu1 %v138_v56 }
  0x61   :  { %1480 = vmatprep.subr.mxu0 %v232_v59  ;;  %322 = vperm.xlu1 %1615, %v284_v60  }
  0x62   :  { %655 = vmatmul.mubr.f32.gmra.mxu1 %v137_v61  ;;  %1481 = vmatpush3.msra.mxu0 %v216_v62 }
  0x63   :  { %1560 = vmatprep.subr.mxu1 %v264_v63  ;;  %514 = vmatprep.mubr.f32.mxu0 %v144_v0 }
  0x64   :  { %12 = vsyncpa [#allocation4], 0  ;;  %1561 = vmatpush3.msra.mxu1 %v248_v2  ;;  %1135 = vperm.xlu0 %1616, %v1101_v1   ;;  %v145_v8 = vld [vmem:[%s2750_s1 + $0x3d0] sm:$0xff]  ;;  %v215_v9 = vld [vmem:[%s2749_s0 + $0x200] sm:$0xff]  ;;  %v1104_v12 = vmul.f32 2.0, %v2279_v5  ;;  %vm955_vm0 = vcmask 125952  }
  0x65   :  { %515 = vmatmul.mubr.f32.gmra.mxu0 %v143_v3  ;;  %659 = vmatprep.mubr.f32.mxu1 %v146_v4  ;;  %v263_v10 = vld [vmem:[%s2749_s0 + $0x380] sm:$0xff]  ;;  %v28_v11 = vld [vmem:[%s2750_s1 + $0x28] sm:$0xff]  ;;  %v2306_v14 = vld [vmem:[%s2752_s3 + $0x50] sm:$0xff]  ;;  %vm1225_vm1 = vcmask 130048   ;;  %vm1276_vm2 = vcmask 122880  }
  0x66   :  { %1482 = vmatprep.subr.mxu0 %v231_v6  ;;  %332 = vperm.xlu1 %1615, %v286_v7   ;;  %v247_v13 = vld [vmem:[%s2749_s0 + $0x300] sm:$0xff]  ;;  %v30_v16 = vld [vmem:[%s2750_s1 + $0x38] sm:$0xff]  ;;  %v288_v17 = vld [vmem:[%s2751_s2 + $0x48] sm:$0xff]  ;;  %v1107_v20 = vmul.f32 2.0, %v2306_v14 }
  0x67   :  { %660 = vmatmul.mubr.f32.gmra.mxu1 %v145_v8  ;;  %1483 = vmatpush3.msra.mxu0 %v215_v9  ;;  %v27_v15 = vld [vmem:[%s2750_s1 + $0x20] sm:$0xff]  ;;  %v29_v18 = vld [vmem:[%s2750_s1 + $0x30] sm:$0xff]  ;;  %v36_v19 = vld [vmem:[%s2750_s1 + $0x68] sm:$0xff] }
  0x68   :  { %1562 = vmatprep.subr.mxu1 %v263_v10  ;;  %729 = vmatprep.mubr.f32.mxu0 %v28_v11  ;;  %v38_v21 = vld [vmem:[%s2750_s1 + $0x78] sm:$0xff]  ;;  %v35_v22 = vld [vmem:[%s2750_s1 + $0x60] sm:$0xff]  ;;  %v37_v24 = vld [vmem:[%s2750_s1 + $0x70] sm:$0xff] }
  0x69   :  { %1563 = vmatpush3.msra.mxu1 %v247_v13  ;;  %1150 = vperm.xlu0 %1616, %v1104_v12   ;;  %v290_v23 = vld [vmem:[%s2751_s2 + $0x58] sm:$0xff]  ;;  %v44_v25 = vld [vmem:[%s2750_s1 + $0xa8] sm:$0xff]  ;;  %v43_v27 = vld [vmem:[%s2750_s1 + $0xa0] sm:$0xff] }
  0x6a   :  { %730 = vmatmul.mubr.f32.vlgmr.msra.gmra.mxu0 %v27_v15  ;;  %874 = vmatprep.mubr.f32.mxu1 %v30_v16  ;;  %v46_v26 = vld [vmem:[%s2750_s1 + $0xb8] sm:$0xff]  ;;  %v279_v28 = vld [vmem:[%s2751_s2] sm:$0xff]  ;;  %v292_v29 = vld [vmem:[%s2751_s2 + $0x68] sm:$0xff] }
  0x6b   :  { %342 = vperm.xlu1 %1615, %v288_v17   ;;  %875 = vmatmul.mubr.f32.vlgmr.msra.gmra.mxu1 %v29_v18  ;;  %v45_v30 = vld [vmem:[%s2750_s1 + $0xb0] sm:$0xff]  ;;  %v52_v31 = vld [vmem:[%s2750_s1 + $0xe8] sm:$0xff]  ;;  %v54_v32 = vld [vmem:[%s2750_s1 + $0xf8] sm:$0xff] }
  0x6c   :  { %734 = vmatprep.mubr.f32.mxu0 %v36_v19  ;;  %879 = vmatprep.mubr.f32.mxu1 %v38_v21  ;;  %v51_v33 = vld [vmem:[%s2750_s1 + $0xe0] sm:$0xff]  ;;  %v280_v34 = vld [vmem:[%s2751_s2 + $0x8] sm:$0xff]  ;;  %v294_v35 = vld [vmem:[%s2751_s2 + $0x78] sm:$0xff] }
  0x6d   :  { %1165 = vperm.xlu0 %1616, %v1107_v20   ;;  %v53_v36 = vld [vmem:[%s2750_s1 + $0xf0] sm:$0xff]  ;;  %v60_v37 = vld [vmem:[%s2750_s1 + $0x128] sm:$0xff]  ;;  %v62_v39 = vld [vmem:[%s2750_s1 + $0x138] sm:$0xff] }
  0x6e   :  { %735 = vmatmul.mubr.f32.gmra.mxu0 %v35_v22  ;;  %v59_v40 = vld [vmem:[%s2750_s1 + $0x120] sm:$0xff]  ;;  %v986_v42 = vld [vmem:[%s2752_s3 + $0x8] sm:$0xff]  ;;  %v61_v43 = vld [vmem:[%s2750_s1 + $0x130] sm:$0xff] }
  0x6f   :  { %352 = vperm.xlu1 %1615, %v290_v23   ;;  %880 = vmatmul.mubr.f32.gmra.mxu1 %v37_v24  ;;  %v283_v41 = vld [vmem:[%s2751_s2 + $0x20] sm:$0xff]  ;;  %v68_v44 = vld [vmem:[%s2750_s1 + $0x168] sm:$0xff]  ;;  %v70_v45 = vld [vmem:[%s2750_s1 + $0x178] sm:$0xff]  ;;  %v1098_v59 = vmul.f32 2.0, %v986_v42 }
  0x70   :  { %739 = vmatprep.mubr.f32.mxu0 %v44_v25  ;;  %884 = vmatprep.mubr.f32.mxu1 %v46_v26  ;;  %v67_v46 = vld [vmem:[%s2750_s1 + $0x160] sm:$0xff]  ;;  %v285_v48 = vld [vmem:[%s2751_s2 + $0x30] sm:$0xff]  ;;  %v988_v49 = vld [vmem:[%s2752_s3 + $0x18] sm:$0xff] }
  0x71   :  { %1623 = vset.pattern.permute.xlu0 %v1656_v38  ;;  %v69_v50 = vld [vmem:[%s2750_s1 + $0x170] sm:$0xff]  ;;  %v76_v51 = vld [vmem:[%s2750_s1 + $0x1a8] sm:$0xff]  ;;  %v78_v52 = vld [vmem:[%s2750_s1 + $0x1b8] sm:$0xff]  ;;  %v1100_v9 = vmul.f32 2.0, %v988_v49 }
  0x72   :  { %740 = vmatmul.mubr.f32.gmra.mxu0 %v43_v27  ;;  %297 = vperm.xlu0 %1623, %v279_v28   ;;  %v75_v53 = vld [vmem:[%s2750_s1 + $0x1a0] sm:$0xff]  ;;  %v77_v55 = vld [vmem:[%s2750_s1 + $0x1b0] sm:$0xff]  ;;  %v84_v56 = vld [vmem:[%s2750_s1 + $0x1e8] sm:$0xff] }
  0x73   :  { %362 = vperm.xlu1 %1615, %v292_v29   ;;  %885 = vmatmul.mubr.f32.gmra.mxu1 %v45_v30  ;;  %v287_v54 = vld [vmem:[%s2751_s2 + $0x40] sm:$0xff]  ;;  %v86_v60 = vld [vmem:[%s2750_s1 + $0x1f8] sm:$0xff]  ;;  %v987_v61 = vld [vmem:[%s2752_s3 + $0x10] sm:$0xff] }
  0x74   :  { %744 = vmatprep.mubr.f32.mxu0 %v52_v31  ;;  %889 = vmatprep.mubr.f32.mxu1 %v54_v32  ;;  %v83_v62 = vld [vmem:[%s2750_s1 + $0x1e0] sm:$0xff]  ;;  %v289_v63 = vld [vmem:[%s2751_s2 + $0x50] sm:$0xff]  ;;  %v92_v1 = vld [vmem:[%s2750_s1 + $0x228] sm:$0xff]  ;;  %v1099_v3 = vmul.f32 2.0, %v987_v61 }
  0x75   :  { %v85_v0 = vld [vmem:[%s2750_s1 + $0x1f0] sm:$0xff]  ;;  %v94_v2 = vld [vmem:[%s2750_s1 + $0x238] sm:$0xff]  ;;  %v91_v4 = vld [vmem:[%s2750_s1 + $0x220] sm:$0xff] }
  0x76   :  { %745 = vmatmul.mubr.f32.gmra.mxu0 %v51_v33  ;;  %302 = vperm.xlu0 %1623, %v280_v34   ;;  %v291_v6 = vld [vmem:[%s2751_s2 + $0x60] sm:$0xff]  ;;  %v93_v7 = vld [vmem:[%s2750_s1 + $0x230] sm:$0xff]  ;;  %v100_v8 = vld [vmem:[%s2750_s1 + $0x268] sm:$0xff] }
  0x77   :  { %372 = vperm.xlu1 %1615, %v294_v35   ;;  %890 = vmatmul.mubr.f32.gmra.mxu1 %v53_v36  ;;  %v102_v10 = vld [vmem:[%s2750_s1 + $0x278] sm:$0xff]  ;;  %v99_v11 = vld [vmem:[%s2750_s1 + $0x260] sm:$0xff]  ;;  %v293_v12 = vld [vmem:[%s2751_s2 + $0x70] sm:$0xff] }
  0x78   :  { %749 = vmatprep.mubr.f32.mxu0 %v60_v37  ;;  %894 = vmatprep.mubr.f32.mxu1 %v62_v39  ;;  %v101_v13 = vld [vmem:[%s2750_s1 + $0x270] sm:$0xff]  ;;  %v108_v15 = vld [vmem:[%s2750_s1 + $0x2a8] sm:$0xff]  ;;  %v110_v16 = vld [vmem:[%s2750_s1 + $0x2b8] sm:$0xff] }
  0x79   :  { %v107_v17 = vld [vmem:[%s2750_s1 + $0x2a0] sm:$0xff]  ;;  %v109_v18 = vld [vmem:[%s2750_s1 + $0x2b0] sm:$0xff]  ;;  %v116_v19 = vld [vmem:[%s2750_s1 + $0x2e8] sm:$0xff] }
  0x7a   :  { %750 = vmatmul.mubr.f32.gmra.mxu0 %v59_v40  ;;  %317 = vperm.xlu0 %1623, %v283_v41   ;;  %v118_v20 = vld [vmem:[%s2750_s1 + $0x2f8] sm:$0xff]  ;;  %v990_v21 = vld [vmem:[%s2752_s3 + $0x28] sm:$0xff]  ;;  %v115_v22 = vld [vmem:[%s2750_s1 + $0x2e0] sm:$0xff] }
  0x7b   :  { %1008 = vperm.xlu1 %1615, %v986_v42   ;;  %895 = vmatmul.mubr.f32.gmra.mxu1 %v61_v43  ;;  %v117_v23 = vld [vmem:[%s2750_s1 + $0x2f0] sm:$0xff]  ;;  %v124_v24 = vld [vmem:[%s2750_s1 + $0x328] sm:$0xff]  ;;  %v123_v26 = vld [vmem:[%s2750_s1 + $0x320] sm:$0xff]  ;;  %v1102_v30 = vmul.f32 2.0, %v990_v21 }
  0x7c   :  { %754 = vmatprep.mubr.f32.mxu0 %v68_v44  ;;  %899 = vmatprep.mubr.f32.mxu1 %v70_v45  ;;  %v991_v25 = vld [vmem:[%s2752_s3 + $0x30] sm:$0xff]  ;;  %v132_v28 = vld [vmem:[%s2750_s1 + $0x368] sm:$0xff]  ;;  %v134_v29 = vld [vmem:[%s2750_s1 + $0x378] sm:$0xff] }
  0x7d   :  { %v125_v27 = vld [vmem:[%s2750_s1 + $0x330] sm:$0xff]  ;;  %v131_v31 = vld [vmem:[%s2750_s1 + $0x360] sm:$0xff]  ;;  %v140_v33 = vld [vmem:[%s2750_s1 + $0x3a8] sm:$0xff]  ;;  %v1103_v34 = vmul.f32 2.0, %v991_v25 }
  0x7e   :  { %755 = vmatmul.mubr.f32.gmra.mxu0 %v67_v46  ;;  %327 = vperm.xlu0 %1623, %v285_v48   ;;  %v133_v32 = vld [vmem:[%s2750_s1 + $0x370] sm:$0xff]  ;;  %v139_v35 = vld [vmem:[%s2750_s1 + $0x3a0] sm:$0xff]  ;;  %v148_v37 = vld [vmem:[%s2750_s1 + $0x3e8] sm:$0xff] }
  0x7f   :  { %1018 = vperm.xlu1 %1615, %v988_v49   ;;  %900 = vmatmul.mubr.f32.gmra.mxu1 %v69_v50  ;;  %v141_v36 = vld [vmem:[%s2750_s1 + $0x3b0] sm:$0xff]  ;;  %v150_v39 = vld [vmem:[%s2750_s1 + $0x3f8] sm:$0xff]  ;;  %v998_v40 = vld [vmem:[%s2752_s3 + $0x68] sm:$0xff] }
  0x80   :  { %759 = vmatprep.mubr.f32.mxu0 %v76_v51  ;;  %904 = vmatprep.mubr.f32.mxu1 %v78_v52  ;;  %v149_v41 = vld [vmem:[%s2750_s1 + $0x3f0] sm:$0xff]  ;;  %v993_v42 = vld [vmem:[%s2752_s3 + $0x40] sm:$0xff]  ;;  %v994_v43 = vld [vmem:[%s2752_s3 + $0x48] sm:$0xff] }
  0x81   :  { %v1000_v44 = vld [vmem:[%s2752_s3 + $0x78] sm:$0xff]  ;;  %v1105_v46 = vmul.f32 2.0, %v993_v42  ;;  %v1106_v48 = vmul.f32 2.0, %v994_v43  ;;  %v997_v50 = vld [vmem:[%s2752_s3 + $0x60] sm:$0xff] }
  0x82   :  { %760 = vmatmul.mubr.f32.gmra.mxu0 %v75_v53  ;;  %337 = vperm.xlu0 %1623, %v287_v54   ;;  %v1112_v45 = vmul.f32 2.0, %v1000_v44  ;;  %v996_v49 = vld [vmem:[%s2752_s3 + $0x58] sm:$0xff]  ;;  %v1109_v52 = vmul.f32 2.0, %v997_v50  ;;  %v999_v53 = vld [vmem:[%s2752_s3 + $0x70] sm:$0xff]  ;;  %s1658_s3 = smov [#allocation3]  }
  0x83   :  { %905 = vmatmul.mubr.f32.gmra.mxu1 %v77_v55  ;;  %764 = vmatprep.mubr.f32.mxu0 %v84_v56  ;;  %v1108_v51 = vmul.f32 2.0, %v996_v49  ;;  %v1111_v54 = vmul.f32 2.0, %v999_v53  ;;  %v1263_v56 = vld [vmem:[#allocation2] sm:$0x1]  ;;  %s1284_s13 = sshll.u32 %s1658_s3, 4  ;;  %s1285_s13 = int_to_ptr.vmem [resolvable:$true] %s1284_s13 }
  0x84   :  { %909 = vmatprep.mubr.f32.mxu1 %v86_v60  ;;  %1617 = vset.pattern.permute.xlu1 %v1657_v58  ;;  %s1634_s14 = scalar_lea.vmem %s1285_s13, 16  ;;  %s1638_s15 = scalar_lea.vmem %s1285_s13, 32 }
  0x85   :  { %1120 = vperm.xlu1 %1617, %v1098_v59   ;;  %p1635_p0 = scmp.ne.s32.totalorder %s1285_s13, %s1634_s14  ;;  %p1639_p1 = scmp.lt.s32.totalorder %s1285_s13, %s1285_s13 }
  0x86   :  { %765 = vmatmul.mubr.f32.gmra.mxu0 %v83_v62  ;;  %347 = vperm.xlu0 %1623, %v289_v63   ;;  %p1640_p2 = scmp.lt.s32.totalorder %s1638_s15, %s1634_s14 }
  0x87   :  { %910 = vmatmul.mubr.f32.gmra.mxu1 %v85_v0  ;;  %769 = vmatprep.mubr.f32.mxu0 %v92_v1 }
  0x88   :  { %914 = vmatprep.mubr.f32.mxu1 %v94_v2  ;;  %p1641_p3 = por %p1640_p2, %p1639_p1 }
  0x89   :  { %1125 = vperm.xlu1 %1617, %v1099_v3  }
  0x8a   :  { %770 = vmatmul.mubr.f32.gmra.mxu0 %v91_v4  ;;  %357 = vperm.xlu0 %1623, %v291_v6   ;;  %p1642_p4 = pnand %p1641_p3, %p1635_p0 }
  0x8b   :  { %915 = vmatmul.mubr.f32.gmra.mxu1 %v93_v7  ;;  %774 = vmatprep.mubr.f32.mxu0 %v100_v8 }
  0x8c   :  { %919 = vmatprep.mubr.f32.mxu1 %v102_v10 }
  0x8d   :  { %1130 = vperm.xlu1 %1617, %v1100_v9  }
  0x8e   :  { %775 = vmatmul.mubr.f32.gmra.mxu0 %v99_v11  ;;  %367 = vperm.xlu0 %1623, %v293_v12  }
  0x8f   :  { %920 = vmatmul.mubr.f32.gmra.mxu1 %v101_v13  ;;  %779 = vmatprep.mubr.f32.mxu0 %v108_v15 }
  0x90   :  { %924 = vmatprep.mubr.f32.mxu1 %v110_v16 }
  0x91   :  { %1618 = vset.pattern.permute.xlu1 %v1656_v38 }
  0x92   :  { %780 = vmatmul.mubr.f32.gmra.mxu0 %v107_v17  ;;  %1003 = vperm.xlu0 %1623, %v2215_v47   ;;  %v126_v47 = vld [vmem:[%s2750_s1 + $0x338] sm:$0xff] }
  0x93   :  { %925 = vmatmul.mubr.f32.gmra.mxu1 %v109_v18  ;;  %784 = vmatprep.mubr.f32.mxu0 %v116_v19 }
  0x94   :  { %929 = vmatprep.mubr.f32.mxu1 %v118_v20  ;;  %1028 = vperm.xlu1 %1618, %v990_v21  }
  0x96   :  { %785 = vmatmul.mubr.f32.gmra.mxu0 %v115_v22  ;;  %1013 = vperm.xlu0 %1623, %v987_v61  }
  0x97   :  { %930 = vmatmul.mubr.f32.gmra.mxu1 %v117_v23  ;;  %789 = vmatprep.mubr.f32.mxu0 %v124_v24 }
  0x98   :  { %934 = vmatprep.mubr.f32.mxu1 %v126_v47  ;;  %1033 = vperm.xlu1 %1618, %v991_v25  }
  0x9a   :  { %790 = vmatmul.mubr.f32.gmra.mxu0 %v123_v26  ;;  %1023 = vperm.xlu0 %1623, %v2245_v57   ;;  %v142_v57 = vld [vmem:[%s2750_s1 + $0x3b8] sm:$0xff] }
  0x9b   :  { %935 = vmatmul.mubr.f32.gmra.mxu1 %v125_v27  ;;  %794 = vmatprep.mubr.f32.mxu0 %v132_v28 }
  0x9c   :  { %939 = vmatprep.mubr.f32.mxu1 %v134_v29  ;;  %1619 = vset.pattern.permute.xlu1 %v1657_v58 }
  0x9d   :  { %1140 = vperm.xlu1 %1619, %v1102_v30  }
  0x9e   :  { %795 = vmatmul.mubr.f32.gmra.mxu0 %v131_v31  ;;  %1038 = vperm.xlu0 %1623, %v2279_v5   ;;  %v147_v5 = vld [vmem:[%s2750_s1 + $0x3e0] sm:$0xff] }
  0x9f   :  { %940 = vmatmul.mubr.f32.gmra.mxu1 %v133_v32  ;;  %799 = vmatprep.mubr.f32.mxu0 %v140_v33 }
  0xa0   :  { %944 = vmatprep.mubr.f32.mxu1 %v142_v57 }
  0xa1   :  { %1145 = vperm.xlu1 %1619, %v1103_v34  }
  0xa2   :  { %800 = vmatmul.mubr.f32.gmra.mxu0 %v139_v35  ;;  %1053 = vperm.xlu0 %1623, %v2306_v14   ;;  %v1110_v14 = vmul.f32 2.0, %v998_v40 }
  0xa3   :  { %945 = vmatmul.mubr.f32.gmra.mxu1 %v141_v36  ;;  %804 = vmatprep.mubr.f32.mxu0 %v148_v37 }
  0xa4   :  { %949 = vmatprep.mubr.f32.mxu1 %v150_v39 }
  0xa5   :  { %1620 = vset.pattern.permute.xlu1 %v1656_v38 }
  0xa6   :  { %805 = vmatmul.mubr.f32.gmra.mxu0 %v147_v5  ;;  %1068 = vperm.xlu0 %1623, %v998_v40  }
  0xa7   :  { %950 = vmatmul.mubr.f32.gmra.mxu1 %v149_v41  ;;  %1043 = vperm.xlu1 %1620, %v993_v42  }
  0xaa   :  { %1626 = vset.pattern.permute.xlu0 %v1657_v58 }
  0xab   :  { %1048 = vperm.xlu1 %1620, %v994_v43   ;;  %1180 = vperm.xlu0 %1626, %v1110_v14  }
  0xaf   :  { %1621 = vset.pattern.permute.xlu1 %v1657_v58  ;;  %1190 = vperm.xlu0 %1626, %v1112_v45  }
  0xb0   :  { %1155 = vperm.xlu1 %1621, %v1105_v46  }
  0xb3   :  { %1629 = vset.pattern.permute.xlu0 %v1656_v38 }
  0xb4   :  { %1160 = vperm.xlu1 %1621, %v1106_v48  }
  0xb8   :  { %1622 = vset.pattern.permute.xlu1 %v1656_v38 }
  0xb9   :  { %1058 = vperm.xlu1 %1622, %v996_v49  }
  0xbd   :  { %1063 = vperm.xlu1 %1622, %v997_v50  }
  0xc1   :  { %1624 = vset.pattern.permute.xlu1 %v1657_v58 }
  0xc2   :  { %1170 = vperm.xlu1 %1624, %v1108_v51  }
  0xc6   :  { %1175 = vperm.xlu1 %1624, %v1109_v52  }
  0xca   :  { %1625 = vset.pattern.permute.xlu1 %v1656_v38 }
  0xcb   :  { %1073 = vperm.xlu1 %1625, %v999_v53  }
  0xcf   :  { %1078 = vperm.xlu1 %1625, %v1000_v44  }
  0xd2   :  { %v308_v55 = vpop.permute.xlu1 %307 }
  0xd3   :  { %1627 = vset.pattern.permute.xlu1 %v1657_v58 }
  0xd4   :  { %1185 = vperm.xlu1 %1627, %v1111_v54  }
  0xd7   :  { %v313_v59 = vpop.permute.xlu1 %312 }
  0xd8   :  { %1628 = vset.pattern.permute.xlu1 %v1656_v38 }
  0xd9   :  { %1266 = vperm.xlu1 %1628, %v1263_v56  }
  0xda   :  { %v2587_v60 = vpop.permute.xlu0 %1115 }
  0xdc   :  { %v323_v61 = vpop.permute.xlu1 %322 }
  0xdf   :  { %v2589_v62 = vpop.permute.xlu0 %1135 }
  0xe1   :  { %v2591_v63 = vpop.permute.xlu1 %332 }
  0xe4   :  { %v2593_v0 = vpop.permute.xlu0 %1150 }
  0xe5   :  { %v1324_v1 = vpop.f32.mrf.mxu0 }
  0xe6   :  { %v2595_v2 = vpop.permute.xlu1 %342 }
  0xe7   :  { %v1404_v3 = vpop.f32.mrf.mxu1  ;;  %v1325_v58 = vpop.f32.mrf.mxu0 }
  0xe8   :  { %v2597_v4 = vpop.permute.xlu0 %1165  ;;  %v1326_v6 = vadd.f32 %v1325_v58, %v1324_v1 }
  0xe9   :  { %v1405_v7 = vpop.f32.mrf.mxu1  ;;  %v1327_v38 = vpop.f32.mrf.mxu0 }
  0xea   :  { %v2599_v8 = vpop.permute.xlu1 %352  ;;  %v1406_v9 = vadd.f32 %v1405_v7, %v1404_v3 }
  0xeb   :  { %v1407_v10 = vpop.f32.mrf.mxu1  ;;  %v1328_v11 = vpop.f32.mrf.mxu0 }
  0xec   :  { %v1329_v12 = vadd.f32 %v1328_v11, %v1327_v38 }
  0xed   :  { %v298_v13 = vpop.permute.xlu0 %297  ;;  %v1408_v15 = vpop.f32.mrf.mxu1 }
  0xee   :  { %v442_v16 = vadd.f32 %v1326_v6, %v298_v13  ;;  %v1409_v17 = vadd.f32 %v1408_v15, %v1407_v10  ;;  %v1330_v18 = vpop.f32.mrf.mxu0  ;;  %v2601_v20 = vpop.permute.xlu1 %362 }
  0xef   :  { %v1410_v19 = vpop.f32.mrf.mxu1 }
  0xf0   :  { %v2603_v21 = vadd.f32 %v1406_v9, %v442_v16  ;;  %v1331_v22 = vpop.f32.mrf.mxu0 }
  0xf1   :  { %v303_v23 = vpop.permute.xlu0 %302  ;;  %v1332_v24 = vadd.f32 %v1331_v22, %v1330_v18  ;;  %v1411_v47 = vpop.f32.mrf.mxu1 }
  0xf2   :  { %v447_v25 = vadd.f32 %v1329_v12, %v303_v23  ;;  %v1412_v26 = vadd.f32 %v1411_v47, %v1410_v19  ;;  %v1333_v27 = vpop.f32.mrf.mxu0  ;;  %v2609_v36 = vpop.permute.xlu1 %372 }
  0xf3   :  { %v452_v28 = vadd.f32 %v1332_v24, %v308_v55  ;;  %v1413_v29 = vpop.f32.mrf.mxu1 }
  0xf4   :  { %v2605_v30 = vadd.f32 %v1409_v17, %v447_v25  ;;  %v1334_v31 = vpop.f32.mrf.mxu0 }
  0xf5   :  { %v2607_v32 = vadd.f32 %v1412_v26, %v452_v28  ;;  %v1335_v33 = vadd.f32 %v1334_v31, %v1333_v27  ;;  %v1414_v57 = vpop.f32.mrf.mxu1  ;;  %v318_v40 = vpop.permute.xlu0 %317 }
  0xf6   :  { %v1415_v34 = vadd.f32 %v1414_v57, %v1413_v29  ;;  %v1336_v35 = vpop.f32.mrf.mxu0  ;;  %v2613_v49 = vpop.permute.xlu1 %1008 }
  0xf7   :  { %v457_v37 = vadd.f32 %v1335_v33, %v313_v59  ;;  %v1416_v39 = vpop.f32.mrf.mxu1 }
  0xf8   :  { %v1337_v5 = vpop.f32.mrf.mxu0 }
  0xf9   :  { %v2611_v41 = vadd.f32 %v1415_v34, %v457_v37  ;;  %v1338_v42 = vadd.f32 %v1337_v5, %v1336_v35  ;;  %v1417_v14 = vpop.f32.mrf.mxu1  ;;  %v328_v1 = vpop.permute.xlu0 %327 }
  0xfa   :  { %v1418_v43 = vadd.f32 %v1417_v14, %v1416_v39  ;;  %v1339_v44 = vpop.f32.mrf.mxu0  ;;  %v2619_v9 = vpop.permute.xlu1 %1018 }
  0xfb   :  { %v462_v45 = vadd.f32 %v1338_v42, %v318_v40  ;;  %v1419_v46 = vpop.f32.mrf.mxu1 }
  0xfc   :  { %v1340_v48 = vpop.f32.mrf.mxu0 }
  0xfd   :  { %v2615_v50 = vadd.f32 %v1418_v43, %v462_v45  ;;  %v1341_v51 = vadd.f32 %v1340_v48, %v1339_v44  ;;  %v1420_v52 = vpop.f32.mrf.mxu1  ;;  %v338_v26 = vpop.permute.xlu0 %337 }
  0xfe   :  { %v1421_v53 = vadd.f32 %v1420_v52, %v1419_v46  ;;  %v1342_v54 = vpop.f32.mrf.mxu0 }
  0xff   :  { %v467_v55 = vadd.f32 %v1341_v51, %v323_v61  ;;  %v1422_v56 = vpop.f32.mrf.mxu1 }
 0x100   :  { %v1343_v59 = vpop.f32.mrf.mxu0  ;;  %v2624_v22 = vpop.permute.xlu1 %1120 }
 0x101   :  { %v2617_v3 = vadd.f32 %v1421_v53, %v467_v55  ;;  %v1344_v58 = vadd.f32 %v1343_v59, %v1342_v54  ;;  %v1423_v6 = vpop.f32.mrf.mxu1  ;;  %v348_v45 = vpop.permute.xlu0 %347 }
 0x102   :  { %v1424_v7 = vadd.f32 %v1423_v6, %v1422_v56  ;;  %v1345_v38 = vpop.f32.mrf.mxu0 }
 0x103   :  { %v472_v10 = vadd.f32 %v1344_v58, %v328_v1  ;;  %v1425_v11 = vpop.f32.mrf.mxu1 }
 0x104   :  { %v1346_v12 = vpop.f32.mrf.mxu0  ;;  %v2630_v37 = vpop.permute.xlu1 %1125 }
 0x105   :  { %v2621_v13 = vadd.f32 %v1424_v7, %v472_v10  ;;  %v1347_v15 = vadd.f32 %v1346_v12, %v1345_v38  ;;  %v1426_v16 = vpop.f32.mrf.mxu1  ;;  %v358_v10 = vpop.permute.xlu0 %357 }
 0x106   :  { %v1427_v17 = vadd.f32 %v1426_v16, %v1425_v11  ;;  %v1348_v61 = vpop.f32.mrf.mxu0 }
 0x107   :  { %v477_v18 = vadd.f32 %v1347_v15, %v2591_v63  ;;  %v1428_v19 = vpop.f32.mrf.mxu1 }
 0x108   :  { %v1349_v23 = vpop.f32.mrf.mxu0  ;;  %v2635_v53 = vpop.permute.xlu1 %1130 }
 0x109   :  { %v2626_v24 = vadd.f32 %v1427_v17, %v477_v18  ;;  %v1350_v47 = vadd.f32 %v1349_v23, %v1348_v61  ;;  %v1429_v25 = vpop.f32.mrf.mxu1 }
 0x10a   :  { %v1430_v27 = vadd.f32 %v1429_v25, %v1428_v19  ;;  %v1351_v28 = vpop.f32.mrf.mxu0 }
 0x10b   :  { %v482_v29 = vadd.f32 %v1350_v47, %v338_v26  ;;  %v1431_v31 = vpop.f32.mrf.mxu1 }
 0x10c   :  { %v1352_v33 = vpop.f32.mrf.mxu0 }
 0x10d   :  { %v2628_v57 = vadd.f32 %v1430_v27, %v482_v29  ;;  %v1353_v34 = vadd.f32 %v1352_v33, %v1351_v28  ;;  %v1432_v35 = vpop.f32.mrf.mxu1 }
 0x10e   :  { %v1433_v63 = vadd.f32 %v1432_v35, %v1431_v31  ;;  %v1354_v39 = vpop.f32.mrf.mxu0 }
 0x10f   :  { %v487_v5 = vadd.f32 %v1353_v34, %v2595_v2  ;;  %v1434_v40 = vpop.f32.mrf.mxu1  ;;  %v2640_v6 = vpop.permute.xlu1 %1028 }
 0x110   :  { %v1355_v42 = vpop.f32.mrf.mxu0  ;;  %v368_v34 = vpop.permute.xlu0 %367 }
 0x111   :  { %v2633_v14 = vadd.f32 %v1433_v63, %v487_v5  ;;  %v1356_v43 = vadd.f32 %v1355_v42, %v1354_v39  ;;  %v1435_v44 = vpop.f32.mrf.mxu1 }
 0x112   :  { %v1436_v46 = vadd.f32 %v1435_v44, %v1434_v40  ;;  %v1357_v48 = vpop.f32.mrf.mxu0 }
 0x113   :  { %v492_v51 = vadd.f32 %v1356_v43, %v348_v45  ;;  %v1437_v52 = vpop.f32.mrf.mxu1  ;;  %v2646_v26 = vpop.permute.xlu1 %1033 }
 0x114   :  { %v1358_v54 = vpop.f32.mrf.mxu0 }
 0x115   :  { %v2637_v55 = vadd.f32 %v1436_v46, %v492_v51  ;;  %v1359_v56 = vadd.f32 %v1358_v54, %v1357_v48  ;;  %v1438_v59 = vpop.f32.mrf.mxu1 }
 0x116   :  { %v1439_v1 = vadd.f32 %v1438_v59, %v1437_v52  ;;  %v1360_v2 = vpop.f32.mrf.mxu0 }
 0x117   :  { %v497_v58 = vadd.f32 %v1359_v56, %v2599_v8 }
 0x118   :  { %v1440_v7 = vpop.f32.mrf.mxu1  ;;  %v1361_v38 = vpop.f32.mrf.mxu0 }
 0x119   :  { %v2642_v11 = vadd.f32 %v1439_v1, %v497_v58  ;;  %v1362_v12 = vadd.f32 %v1361_v38, %v1360_v2  ;;  %v2651_v39 = vpop.permute.xlu1 %1140 }
 0x11a   :  { %v1441_v15 = vpop.f32.mrf.mxu1  ;;  %v1363_v16 = vpop.f32.mrf.mxu0 }
 0x11b   :  { %v502_v17 = vadd.f32 %v1362_v12, %v358_v10  ;;  %v1442_v61 = vadd.f32 %v1441_v15, %v1440_v7 }
 0x11c   :  { %v1443_v18 = vpop.f32.mrf.mxu1  ;;  %v1364_v19 = vpop.f32.mrf.mxu0 }
 0x11d   :  { %v2644_v23 = vadd.f32 %v1442_v61, %v502_v17  ;;  %v1365_v47 = vadd.f32 %v1364_v19, %v1363_v16  ;;  %v2663_v48 = vpop.permute.xlu1 %1145  ;;  %v1004_v16 = vpop.permute.xlu0 %1003 }
 0x11e   :  { %v1444_v25 = vpop.f32.mrf.mxu1 }
 0x11f   :  { %v507_v8 = vadd.f32 %v1365_v47, %v2601_v20  ;;  %v1445_v27 = vadd.f32 %v1444_v25, %v1443_v18 }
 0x120   :  { %v1366_v28 = vpop.f32.mrf.mxu0 }
 0x121   :  { %v2649_v29 = vadd.f32 %v1445_v27, %v507_v8 }
 0x122   :  { %v1446_v31 = vpop.f32.mrf.mxu1  ;;  %v1367_v33 = vpop.f32.mrf.mxu0 }
 0x123   :  { %v1368_v35 = vadd.f32 %v1367_v33, %v1366_v28  ;;  %v2666_v38 = vpop.permute.xlu1 %1043 }
 0x124   :  { %v1447_v63 = vpop.f32.mrf.mxu1 }
 0x125   :  { %v512_v5 = vadd.f32 %v1368_v35, %v368_v34  ;;  %v1448_v40 = vadd.f32 %v1447_v63, %v1446_v31  ;;  %v2653_v42 = vpop.f32.mrf.mxu0 }
 0x127   :  { %v2655_v43 = vadd.f32 %v1448_v40, %v512_v5  ;;  %v2657_v44 = vpop.f32.mrf.mxu1  ;;  %v2659_v20 = vpop.f32.mrf.mxu0 }
 0x128   :  { %v2675_v35 = vpop.permute.xlu1 %1048 }
 0x129   :  { %v2661_v45 = vpop.f32.mrf.mxu1 }
 0x12a   :  { %v1484_v46 = vpop.f32.mrf.mxu0 }
 0x12b   :  { %v1564_v51 = vpop.f32.mrf.mxu1 }
 0x12c   :  { %v1485_v52 = vpop.f32.mrf.mxu0 }
 0x12d   :  { %v1486_v54 = vadd.f32 %v1485_v52, %v1484_v46  ;;  %v1565_v56 = vpop.f32.mrf.mxu1 }
 0x12e   :  { %v1487_v59 = vpop.f32.mrf.mxu0  ;;  %v1566_v2 = vadd.f32 %v1565_v56, %v1564_v51 }
 0x12f   :  { %v732_v1 = vadd.f32 %v1486_v54, %v2603_v21  ;;  %v1567_v58 = vpop.f32.mrf.mxu1 }
 0x130   :  { %v1488_v7 = vpop.f32.mrf.mxu0 }
 0x131   :  { %v2668_v10 = vadd.f32 %v1566_v2, %v732_v1  ;;  %v1489_v12 = vadd.f32 %v1488_v7, %v1487_v59  ;;  %v1568_v15 = vpop.f32.mrf.mxu1  ;;  %v1014_v2 = vpop.permute.xlu0 %1013 }
 0x132   :  { %v1490_v17 = vpop.f32.mrf.mxu0  ;;  %v1569_v19 = vadd.f32 %v1568_v15, %v1567_v58 }
 0x133   :  { %v956_v61 = vsel %vm955_vm0, %v2668_v10, -inf  ;;  %v737_v18 = vadd.f32 %v1489_v12, %v2605_v30  ;;  %v1081_v21 = vmul.f32 %v1004_v16, %v2668_v10  ;;  %v1570_v47 = vpop.f32.mrf.mxu1 }
 0x134   :  { %v957_v25 = vrot.slane %v956_v61, 4  ;;  %v1491_v8 = vpop.f32.mrf.mxu0 }
 0x135   :  { %v882_v27 = vadd.f32 %v1569_v19, %v737_v18  ;;  %v1193_v28 = vsub.f32 %v1081_v21, %v2587_v60  ;;  %v1492_v31 = vadd.f32 %v1491_v8, %v1490_v17  ;;  %v1571_v33 = vpop.f32.mrf.mxu1  ;;  %v2683_v18 = vpop.permute.xlu1 %1155 }
 0x136   :  { %v1493_v34 = vpop.f32.mrf.mxu0  ;;  %v958_v63 = vmax.f32 %v956_v61, %v957_v25  ;;  %v1572_v30 = vadd.f32 %v1571_v33, %v1570_v47 }
 0x137   :  { %v1082_v5 = vmul.f32 %v2613_v49, %v882_v27  ;;  %v742_v40 = vadd.f32 %v1492_v31, %v2607_v32  ;;  %v1573_v46 = vpop.f32.mrf.mxu1  ;;  %v1209_v51 = vmul.f32 %v1193_v28, %v2668_v10 }
 0x138   :  { %v1494_v52 = vpop.f32.mrf.mxu0  ;;  %v959_v54 = vrot.slane %v958_v63, 2 }
 0x139   :  { %v1194_v56 = vsub.f32 %v1082_v5, %v2624_v22  ;;  %v887_v60 = vadd.f32 %v1572_v30, %v742_v40  ;;  %v1495_v59 = vadd.f32 %v1494_v52, %v1493_v34  ;;  %v1574_v1 = vpop.f32.mrf.mxu1  ;;  %v1226_v17 = vsel %vm1225_vm1, %v1209_v51, 0.0 }
 0x13a   :  { %v1496_v58 = vpop.f32.mrf.mxu0  ;;  %v960_v7 = vmax.f32 %v958_v63, %v959_v54  ;;  %v1575_v32 = vadd.f32 %v1574_v1, %v1573_v46  ;;  %v1024_v46 = vpop.permute.xlu0 %1023 }
 0x13b   :  { %v1210_v12 = vmul.f32 %v1194_v56, %v882_v27  ;;  %v1083_v15 = vmul.f32 %v1014_v2, %v887_v60  ;;  %v747_v49 = vadd.f32 %v1495_v59, %v2611_v41  ;;  %v1576_v16 = vpop.f32.mrf.mxu1  ;;  %v2695_v1 = vpop.permute.xlu1 %1160 }
 0x13c   :  { %v1497_v61 = vpop.f32.mrf.mxu0  ;;  %v961_v19 = vrot.slane %v960_v7, 1 }
 0x13d   :  { %v1227_v22 = vsel %vm1225_vm1, %v1210_v12, 0.0  ;;  %v1195_v21 = vsub.f32 %v1083_v15, %v2630_v37  ;;  %v892_v47 = vadd.f32 %v1575_v32, %v747_v49  ;;  %v1498_v25 = vadd.f32 %v1497_v61, %v1496_v58  ;;  %v1577_v8 = vpop.f32.mrf.mxu1 }
 0x13e   :  { %v1228_v28 = vadd.f32 %v1227_v22, %v1226_v17  ;;  %v1499_v27 = vpop.f32.mrf.mxu0  ;;  %v2687_v31 = vmax.f32 %v960_v7, %v961_v19  ;;  %v1578_v63 = vadd.f32 %v1577_v8, %v1576_v16 }
 0x13f   :  { %v1211_v41 = vmul.f32 %v1195_v21, %v887_v60  ;;  %v1084_v33 = vmul.f32 %v2619_v9, %v892_v47  ;;  %v752_v34 = vadd.f32 %v1498_v25, %v2615_v50  ;;  %v1579_v5 = vpop.f32.mrf.mxu1 }
 0x140   :  { %v1500_v40 = vpop.f32.mrf.mxu0  ;;  %v963_v30 = vsub.f32 %v2668_v10, %v2687_v31 }
 0x141   :  { %v1229_v37 = vsel %vm1225_vm1, %v1211_v41, 0.0  ;;  %v1196_v51 = vsub.f32 %v1084_v33, %v2635_v53  ;;  %v897_v52 = vadd.f32 %v1578_v63, %v752_v34  ;;  %v1501_v54 = vadd.f32 %v1500_v40, %v1499_v27  ;;  %v1580_v56 = vpop.f32.mrf.mxu1 }
 0x142   :  { %v1230_v59 = vadd.f32 %v1229_v37, %v1228_v28  ;;  %v1502_v60 = vpop.f32.mrf.mxu0  ;;  %v964_v9 = vmul.f32 1.442695, %v963_v30  ;;  %v1581_v7 = vadd.f32 %v1580_v56, %v1579_v5  ;;  %v2702_v28 = vpop.permute.xlu1 %1058 }
 0x143   :  { %v1212_v50 = vmul.f32 %v1196_v51, %v892_v47  ;;  %v1085_v2 = vmul.f32 %v1024_v46, %v897_v52  ;;  %v757_v58 = vadd.f32 %v1501_v54, %v2617_v3  ;;  %v1582_v12 = vpop.f32.mrf.mxu1  ;;  %v1039_v51 = vpop.permute.xlu0 %1038 }
 0x144   :  { %v1503_v15 = vpop.f32.mrf.mxu0  ;;  %1630 = vpow2.f32 %v964_v9 }
 0x145   :  { %v1231_v49 = vsel %vm1225_vm1, %v1212_v50, 0.0  ;;  %v1197_v53 = vsub.f32 %v1085_v2, %v2589_v62  ;;  %v902_v32 = vadd.f32 %v1581_v7, %v757_v58  ;;  %v1504_v16 = vadd.f32 %v1503_v15, %v1502_v60  ;;  %v1583_v17 = vpop.f32.mrf.mxu1 }
 0x146   :  { %v1232_v61 = vadd.f32 %v1231_v49, %v1230_v59  ;;  %v1505_v19 = vpop.f32.mrf.mxu0  ;;  %v1584_v25 = vadd.f32 %v1583_v17, %v1582_v12  ;;  %v2710_v50 = vpop.permute.xlu1 %1063 }
 0x147   :  { %v1213_v22 = vmul.f32 %v1197_v53, %v897_v52  ;;  %v1086_v21 = vmul.f32 %v2640_v6, %v902_v32  ;;  %v762_v47 = vadd.f32 %v1504_v16, %v2621_v13  ;;  %v1585_v3 = vpop.f32.mrf.mxu1 }
 0x148   :  { %v1506_v8 = vpop.f32.mrf.mxu0 }
 0x149   :  { %v1233_v27 = vsel %vm1225_vm1, %v1213_v22, 0.0  ;;  %v1198_v41 = vsub.f32 %v1086_v21, %v2651_v39  ;;  %v907_v62 = vadd.f32 %v1584_v25, %v762_v47  ;;  %v1507_v33 = vadd.f32 %v1506_v8, %v1505_v19  ;;  %v1586_v34 = vpop.f32.mrf.mxu1 }
 0x14a   :  { %v1234_v63 = vadd.f32 %v1233_v27, %v1232_v61  ;;  %v1508_v5 = vpop.f32.mrf.mxu0  ;;  %v1587_v13 = vadd.f32 %v1586_v34, %v1585_v3  ;;  %v1171_v27 = vpop.permute.xlu1 %1170 }
 0x14b   :  { %v1214_v40 = vmul.f32 %v1198_v41, %v902_v32  ;;  %v1087_v30 = vmul.f32 %v2646_v26, %v907_v62  ;;  %v767_v6 = vadd.f32 %v1507_v33, %v2626_v24  ;;  %v1588_v46 = vpop.f32.mrf.mxu1 }
 0x14c   :  { %v1509_v37 = vpop.f32.mrf.mxu0 }
 0x14d   :  { %v1235_v52 = vsel %vm1225_vm1, %v1214_v40, 0.0  ;;  %v1199_v54 = vsub.f32 %v1087_v30, %v2663_v48  ;;  %v912_v56 = vadd.f32 %v1587_v13, %v767_v6  ;;  %v1510_v39 = vadd.f32 %v1509_v37, %v1508_v5  ;;  %v1589_v59 = vpop.f32.mrf.mxu1  ;;  %v1054_v37 = vpop.permute.xlu0 %1053 }
 0x14e   :  { %v1236_v60 = vadd.f32 %v1235_v52, %v1234_v63  ;;  %v1511_v9 = vpop.f32.mrf.mxu0  ;;  %v1590_v24 = vadd.f32 %v1589_v59, %v1588_v46 }
 0x14f   :  { %v1215_v2 = vmul.f32 %v1199_v54, %v907_v62  ;;  %v1088_v58 = vmul.f32 %v1039_v51, %v912_v56  ;;  %v772_v26 = vadd.f32 %v1510_v39, %v2628_v57  ;;  %v1591_v7 = vpop.f32.mrf.mxu1 }
 0x150   :  { %v1512_v12 = vpop.f32.mrf.mxu0 }
 0x151   :  { %v1631_v15 = vpop.eup %1630  ;;  %v1237_v49 = vsel %vm1225_vm1, %v1215_v2, 0.0  ;;  %v1200_v53 = vsub.f32 %v1088_v58, %v2593_v0  ;;  %v917_v48 = vadd.f32 %v1590_v24, %v772_v26  ;;  %v1513_v32 = vadd.f32 %v1512_v12, %v1511_v9  ;;  %v1592_v16 = vpop.f32.mrf.mxu1 }
 0x152   :  { %v1238_v17 = vadd.f32 %v1237_v49, %v1236_v60  ;;  %v1593_v61 = vadd.f32 %v1592_v16, %v1591_v7  ;;  %v1514_v19 = vpop.f32.mrf.mxu0  ;;  %v966_v22 = vsel %vm955_vm0, %v1631_v15, 0.0  ;;  %v1176_v60 = vpop.permute.xlu1 %1175 }
 0x153   :  { %v1216_v21 = vmul.f32 %v1200_v53, %v912_v56  ;;  %v1089_v47 = vmul.f32 %v2666_v38, %v917_v48  ;;  %v777_v57 = vadd.f32 %v1513_v32, %v2633_v14  ;;  %v1594_v25 = vpop.f32.mrf.mxu1  ;;  %v967_v3 = vrot.slane %v966_v22, 4 }
 0x154   :  { %v1515_v8 = vpop.f32.mrf.mxu0 }
 0x155   :  { %v1239_v41 = vsel %vm1225_vm1, %v1216_v21, 0.0  ;;  %v1201_v0 = vsub.f32 %v1089_v47, %v2683_v18  ;;  %v922_v62 = vadd.f32 %v1593_v61, %v777_v57  ;;  %v1516_v33 = vadd.f32 %v1515_v8, %v1514_v19  ;;  %v1595_v34 = vpop.f32.mrf.mxu1  ;;  %v1069_v57 = vpop.permute.xlu0 %1068 }
 0x156   :  { %v1240_v63 = vadd.f32 %v1239_v41, %v1238_v17  ;;  %v1517_v5 = vpop.f32.mrf.mxu0  ;;  %v968_v40 = vadd.f32 %v967_v3, %v966_v22  ;;  %v1596_v14 = vadd.f32 %v1595_v34, %v1594_v25  ;;  %v1371_v22 = vadd.f32 %v2659_v20, %v2653_v42  ;;  %v1074_v47 = vpop.permute.xlu1 %1073 }
 0x157   :  { %v1217_v30 = vmul.f32 %v1201_v0, %v917_v48  ;;  %v1090_v6 = vmul.f32 %v2675_v35, %v922_v62  ;;  %v782_v38 = vadd.f32 %v1516_v33, %v2637_v55  ;;  %v1597_v13 = vpop.f32.mrf.mxu1 }
 0x158   :  { %v1518_v46 = vpop.f32.mrf.mxu0  ;;  %v969_v9 = vrot.slane %v968_v40, 2  ;;  %v517_v42 = vadd.f32 %v1371_v22, %v2609_v36 }
 0x159   :  { %v1241_v51 = vsel %vm1225_vm1, %v1217_v30, 0.0  ;;  %v1202_v52 = vsub.f32 %v1090_v6, %v2695_v1  ;;  %v927_v18 = vadd.f32 %v1596_v14, %v782_v38  ;;  %v1519_v54 = vadd.f32 %v1518_v46, %v1517_v5  ;;  %v1598_v56 = vpop.f32.mrf.mxu1  ;;  %v1181_v14 = vpop.permute.xlu0 %1180 }
 0x15a   :  { %v1242_v39 = vadd.f32 %v1241_v51, %v1240_v63  ;;  %v1520_v59 = vpop.f32.mrf.mxu0  ;;  %v1599_v55 = vadd.f32 %v1598_v56, %v1597_v13  ;;  %v970_v32 = vadd.f32 %v969_v9, %v968_v40  ;;  %v1451_v13 = vadd.f32 %v2661_v45, %v2657_v44 }
 0x15b   :  { %v1218_v2 = vmul.f32 %v1202_v52, %v922_v62  ;;  %v1091_v58 = vmul.f32 %v1054_v37, %v927_v18  ;;  %v787_v35 = vadd.f32 %v1519_v54, %v2642_v11  ;;  %v1600_v26 = vpop.f32.mrf.mxu1  ;;  %v1079_v37 = vpop.permute.xlu1 %1078 }
 0x15c   :  { %v1521_v24 = vpop.f32.mrf.mxu0  ;;  %v971_v33 = vrot.slane %v970_v32, 1  ;;  %v662_v56 = vadd.f32 %v1451_v13, %v517_v42 }
 0x15d   :  { %v1243_v7 = vsel %vm1225_vm1, %v1218_v2, 0.0  ;;  %v1203_v12 = vsub.f32 %v1091_v58, %v2597_v4  ;;  %v932_v15 = vadd.f32 %v1599_v55, %v787_v35  ;;  %v1522_v1 = vadd.f32 %v1521_v24, %v1520_v59  ;;  %v1601_v49 = vpop.f32.mrf.mxu1 }
 0x15e   :  { %v1244_v53 = vadd.f32 %v1243_v7, %v1242_v39  ;;  %v1523_v48 = vpop.f32.mrf.mxu0  ;;  %v1602_v19 = vadd.f32 %v1601_v49, %v1600_v26  ;;  %v972_v51 = vadd.f32 %v971_v33, %v970_v32 }
 0x15f   :  { %v1219_v16 = vmul.f32 %v1203_v12, %v927_v18  ;;  %v1092_v17 = vmul.f32 %v2702_v28, %v932_v15  ;;  %v792_v61 = vadd.f32 %v1522_v1, %v2644_v23  ;;  %v1603_v11 = vpop.f32.mrf.mxu1  ;;  %v1186_v44 = vpop.permute.xlu1 %1185 }
 0x160   :  { %v1524_v21 = vpop.f32.mrf.mxu0  ;;  %1632 = vlog2.f32 %v972_v51 }
 0x161   :  { %v1245_v4 = vsel %vm1225_vm1, %v1219_v16, 0.0  ;;  %v1204_v25 = vsub.f32 %v1092_v17, %v1171_v27  ;;  %v937_v3 = vadd.f32 %v1602_v19, %v792_v61  ;;  %v1525_v8 = vadd.f32 %v1524_v21, %v1523_v48  ;;  %v1604_v41 = vpop.f32.mrf.mxu1  ;;  %v1191_v48 = vpop.permute.xlu0 %1190 }
 0x162   :  { %v1246_v0 = vadd.f32 %v1245_v4, %v1244_v53  ;;  %v1526_v62 = vpop.f32.mrf.mxu0  ;;  %v1605_v63 = vadd.f32 %v1604_v41, %v1603_v11  ;;  %v1269_v11 = vlaneseq }
 0x163   :  { %v1220_v28 = vmul.f32 %v1204_v25, %v932_v15  ;;  %v1093_v23 = vmul.f32 %v2710_v50, %v937_v3  ;;  %v797_v34 = vadd.f32 %v1525_v8, %v2649_v29  ;;  %v1606_v5 = vpop.f32.mrf.mxu1  ;;  %v976_v15 = vsel %vm955_vm0, %v2668_v10, 0.0  ;;  %v1267_v33 = vpop.permute.xlu1 %1266 }
 0x164   :  { %v1527_v20 = vpop.f32.mrf.mxu0  ;;  %v977_v32 = vrot.slane %v976_v15, 4  ;;  %v1270_v25 = vshrl.u32 %v1269_v11, 7 }
 0x165   :  { %v1247_v40 = vsel %vm1225_vm1, %v1220_v28, 0.0  ;;  %v1205_v30 = vsub.f32 %v1093_v23, %v1176_v60  ;;  %v942_v27 = vadd.f32 %v1605_v63, %v797_v34  ;;  %v1528_v6 = vadd.f32 %v1527_v20, %v1526_v62  ;;  %v1607_v38 = vpop.f32.mrf.mxu1 }
 0x166   :  { %v1248_v46 = vadd.f32 %v1247_v40, %v1246_v0  ;;  %v1529_v50 = vpop.f32.mrf.mxu0  ;;  %v1608_v18 = vadd.f32 %v1607_v38, %v1606_v5  ;;  %v978_v22 = vadd.f32 %v977_v32, %v976_v15  ;;  %v1271_v41 = vsub.s32 0, %v1270_v25 }
 0x167   :  { %v1221_v29 = vmul.f32 %v1205_v30, %v937_v3  ;;  %v802_v52 = vadd.f32 %v1528_v6, %v2655_v43  ;;  %v1609_v36 = vpop.f32.mrf.mxu1  ;;  %v1094_v54 = vmul.f32 %v1069_v57, %v942_v27 }
 0x168   :  { %v1530_v39 = vpop.f32.mrf.mxu0  ;;  %v979_v3 = vrot.slane %v978_v22, 2  ;;  %v1272_v63 = vrot.slane %v1267_v33, %v1271_v41 }
 0x169   :  { %v1249_v59 = vsel %vm1225_vm1, %v1221_v29, 0.0  ;;  %v947_v60 = vadd.f32 %v1608_v18, %v802_v52  ;;  %v1206_v9 = vsub.f32 %v1094_v54, %v1181_v14  ;;  %v1531_v2 = vadd.f32 %v1530_v39, %v1529_v50  ;;  %v1610_v58 = vpop.f32.mrf.mxu1 }
 0x16a   :  { %v1250_v35 = vadd.f32 %v1249_v59, %v1248_v46  ;;  %v1611_v26 = vadd.f32 %v1610_v58, %v1609_v36  ;;  %v980_v62 = vadd.f32 %v979_v3, %v978_v22 }
 0x16b   :  { %v1222_v45 = vmul.f32 %v1206_v9, %v942_v27  ;;  %v807_v55 = vadd.f32 %v1531_v2, %v662_v56  ;;  %v1095_v24 = vmul.f32 %v1074_v47, %v947_v60 }
 0x16c   :  { %v981_v5 = vrot.slane %v980_v62, 1 }
 0x16d   :  { %v1251_v43 = vsel %vm1225_vm1, %v1222_v45, 0.0  ;;  %v952_v7 = vadd.f32 %v1611_v26, %v807_v55  ;;  %v1207_v12 = vsub.f32 %v1095_v24, %v1186_v44  ;;  %v1633_v57 = vpop.eup %1632 }
 0x16e   :  { %v1252_v1 = vadd.f32 %v1251_v43, %v1250_v35  ;;  %v974_v8 = vmul.f32 0.6931472, %v1633_v57  ;;  %v982_v30 = vadd.f32 %v981_v5, %v980_v62 }
 0x16f   :  { %v1223_v49 = vmul.f32 %v1207_v12, %v947_v60  ;;  %v1096_v53 = vmul.f32 %v1079_v37, %v952_v7 }
 0x170   :  { %v975_v23 = vadd.f32 %v974_v8, %v2687_v31 }
 0x171   :  { %v1253_v16 = vsel %vm1225_vm1, %v1223_v49, 0.0  ;;  %v1208_v17 = vsub.f32 %v1096_v53, %v1191_v48 }
 0x172   :  { %v1254_v61 = vadd.f32 %v1253_v16, %v1252_v1  ;;  %v983_v20 = vmul.f32 4.0, %v975_v23 }
 0x173   :  { %v1224_v19 = vmul.f32 %v1208_v17, %v952_v7 }
 0x174   :  { %v984_v6 = vsub.f32 %v982_v30, %v983_v20 }
 0x175   :  { %v1255_v21 = vsel %vm1225_vm1, %v1224_v19, 0.0 }
 0x176   :  { %v1256_v47 = vadd.f32 %v1255_v21, %v1254_v61 }
 0x178   :  { %v1257_v4 = vrot.slane %v1256_v47, 4 }
 0x17a   :  { %v1258_v10 = vadd.f32 %v1257_v4, %v1256_v47 }
 0x17c   :  { %v1259_v0 = vrot.slane %v1258_v10, 2 }
 0x17e   :  { %v1260_v28 = vadd.f32 %v1259_v0, %v1258_v10 }
 0x180   :  { %v1261_v34 = vrot.slane %v1260_v28, 1 }
 0x182   :  { %v1262_v42 = vadd.f32 %v1261_v34, %v1260_v28 }
 0x184   :  { %v1273_v40 = vadd.f32 %v1272_v63, %v1262_v42 }
 0x186   :  { %v1274_v27 = vmul.f32 0.5, %v1273_v40 }
 0x188   :  { %v1275_v38 = vsub.f32 %v984_v6, %v1274_v27 }
 0x18a   :  { %1277 = vst.msk [vmem:[#allocation3] sm:$0x1] %vm1276_vm2, %v1275_v38 }
 0x18b   :  { %1645 = shalt.err (!%p1642_p4)
}
 0x18c   :  { %1287 = dma.vmem_to_hbm [thread:$0]  %s1285_s13, 16, %s2754_s5, [#allocation4]  }
 0x18d   :  { %1654 = dma.done.wait [#allocation4], 16  }
 0x18e   :  { %1655 = vsyncadd [#allocation4], 4294967280 }
 0x18f   :  { %1291 = vsyncpa [#allocation4], 1 }

</bundles_post_ra>
